<compile_context>
chip_gen: v5e
topology: v5e:2x2
jax: 0.10.0
libtpu: 0.0.40
codegen_flags: <defaults>
</compile_context>

<pallas_src>
import functools
import math

import jax
import jax.numpy as jnp
from jax.experimental import pallas as pl
from jax.experimental.pallas import tpu as pltpu


# --------------------------------------------------------------------------- kernel

def _build_kernel(n):
    """Kernel over one (tm, D) row-tile; n = number of list elements."""

    def kernel(scale_ref, *refs):
        # scale_ref : SMEM (2,) f32 -> [1/N, trust_degree/N]
        # refs[:n]  : VMEM (tm, D) tiles of obj_of_nns[i]
        # refs[n:2n]: VMEM (tm, D) tiles of bl_val_detached_list[i]
        # refs[2n]  : VMEM (tm, D) output tile (mean over the stacked axis)
        obj_refs = refs[:n]
        bl_refs = refs[n:2 * n]
        out_ref = refs[2 * n]

        inv_n = scale_ref[0]
        td_over_n = scale_ref[1]

        obj_sum = obj_refs[0][...].astype(jnp.float32)
        for r in obj_refs[1:]:
            obj_sum = obj_sum + r[...].astype(jnp.float32)
        bl_sum = bl_refs[0][...].astype(jnp.float32)
        for r in bl_refs[1:]:
            bl_sum = bl_sum + r[...].astype(jnp.float32)

        out_ref[...] = (inv_n * obj_sum - td_over_n * bl_sum).astype(out_ref.dtype)

    return kernel


# ------------------------------------------------------------------- tiling helpers

# Conservative VMEM budget for the double-buffered tiles: stays well under the
# default scoped limits (16 MiB v5e, 32 MiB v6e/v7x) and v7x's 64 MiB physical VMEM.
_VMEM_TILE_BUDGET = 8 * 1024 * 1024
# Below this total HBM footprint, a fused XLA expression beats kernel launch overhead.
_MIN_PALLAS_BYTES = 128 * 1024


def _pick_tile_m(m, d, n, itemsize):
    # Per grid step the pipeline holds 2 buffers for each of the 2N inputs + 2 for output.
    def tiles_bytes(tm):
        return (2 * n + 1) * 2 * tm * d * itemsize

    for tm in (1024, 512, 256, 128, 64, 32, 16, 8):
        if tm <= m and m % tm == 0 and tiles_bytes(tm) <= _VMEM_TILE_BUDGET:
            return tm
    return 8  # m % 8 == 0 is validated before calling; last resort


def _use_pallas(m, d, n, itemsize):
    if m % 8 != 0 or d % 128 != 0:
        return False  # keep tiles sublane/lane aligned and stores lane-dense
    return 2 * n * m * d * itemsize >= _MIN_PALLAS_BYTES


# ------------------------------------------------------------------------- forward

def _xla_mean(obj_list, bl_list, td, out_dtype):
    """Fused-XLA fallback for tiny or awkwardly shaped inputs."""
    n = len(obj_list)
    obj_sum = sum(o.astype(jnp.float32) for o in obj_list)
    bl_sum = sum(b.astype(jnp.float32) for b in bl_list)
    return ((obj_sum - td.astype(jnp.float32) * bl_sum) / n).astype(out_dtype)


def _forward_mean(obj_list, bl_list, trust_degree):
    """mean over the 'stacked' axis of (obj_i - trust_degree * bl_i)."""
    n = len(obj_list)
    elem_shape = tuple(obj_list[0].shape)
    out_dtype = jnp.result_type(obj_list[0].dtype, bl_list[0].dtype)
    itemsize = max(jnp.dtype(obj_list[0].dtype).itemsize,
                   jnp.dtype(bl_list[0].dtype).itemsize,
                   jnp.dtype(out_dtype).itemsize)

    # Collapse to 2-D (rows, lanes): trailing dim maps to the 128-wide lane axis.
    if len(elem_shape) == 0:
        m, d = 1, 1
    elif len(elem_shape) == 1:
        m, d = 1, elem_shape[0]
    else:
        m, d = math.prod(elem_shape[:-1]), elem_shape[-1]

    td = jnp.asarray(trust_degree, jnp.float32)

    if not _use_pallas(m, d, n, itemsize):
        return _xla_mean(obj_list, bl_list, td, out_dtype)

    obj2d = [o.reshape((m, d)) for o in obj_list]
    bl2d = [b.reshape((m, d)) for b in bl_list]

    tm = _pick_tile_m(m, d, n, itemsize)
    grid = (m // tm,)

    # Fold trust_degree and 1/N into two SMEM scalars read once per tile.
    scales = jnp.stack([jnp.asarray(1.0 / n, jnp.float32), td / n])

    tile_spec = pl.BlockSpec((tm, d), lambda i: (i, 0))
    mean2d = pl.pallas_call(
        _build_kernel(n),
        out_shape=jax.ShapeDtypeStruct((m, d), out_dtype),
        grid=grid,
        in_specs=[pl.BlockSpec(memory_space=pltpu.MemorySpace.SMEM)]
                 + [tile_spec] * (2 * n),
        out_specs=tile_spec,
        compiler_params=pltpu.CompilerParams(
            dimension_semantics=("parallel",),
            vmem_limit_bytes=32 * 1024 * 1024,
        ),
    )(scales, *obj2d, *bl2d)

    return mean2d.reshape(elem_shape)


# ---------------------------------------------------------- custom VJP (torch grads)

@functools.lru_cache(maxsize=None)
def _make_critic_mean(n, elem_shape, obj_dtypes, bl_dtypes):
    obj_dtypes = tuple(jnp.dtype(dt) for dt in obj_dtypes)
    bl_dtypes = tuple(jnp.dtype(dt) for dt in bl_dtypes)

    @jax.custom_vjp
    def critic_mean(obj_list, bl_list, trust_degree):
        return _forward_mean(obj_list, bl_list, trust_degree)

    def fwd(obj_list, bl_list, trust_degree):
        mean = _forward_mean(obj_list, bl_list, trust_degree)
        bl_mean = sum(b.astype(jnp.float32) for b in bl_list) / n
        return mean, bl_mean

    def bwd(bl_mean, g):
        g32 = g.astype(jnp.float32)
        d_obj = [(g32 / n).astype(dt) for dt in obj_dtypes]
        # bl list is "detached" in the PyTorch module -> zero cotangent.
        d_bl = [jnp.zeros(elem_shape, dt) for dt in bl_dtypes]
        d_td = -jnp.sum(g32 * bl_mean)
        return d_obj, d_bl, d_td

    critic_mean.defvjp(fwd, bwd)
    return critic_mean


# ------------------------------------------------------------------------- wrapper

def critic_construct(obj_of_nns, bl_val_detached_list, trust_degree):
    """JAX equivalent of Critic_Construct.forward."""
    obj_list = [jnp.asarray(o) for o in obj_of_nns]
    # The PyTorch inputs are already detached; mirror that explicitly.
    bl_list = [jax.lax.stop_gradient(jnp.asarray(b)) for b in bl_val_detached_list]
    assert len(obj_list) == len(bl_list) and len(obj_list) > 0
    for o, b in zip(obj_list, bl_list):
        assert tuple(o.shape) == tuple(obj_list[0].shape)
        assert tuple(b.shape) == tuple(obj_list[0].shape)

    td = jnp.asarray(trust_degree, jnp.float32)
    fn = _make_critic_mean(
        len(obj_list),
        tuple(obj_list[0].shape),
        tuple(jnp.dtype(o.dtype) for o in obj_list),
        tuple(jnp.dtype(b.dtype) for b in bl_list),
    )
    mean = fn(obj_list, bl_list, td)

    # .detach() == stop_gradient; torch.tensor(param) is a detached scalar copy.
    return jax.lax.stop_gradient(mean), mean, jax.lax.stop_gradient(td)


# ---------------------------------------------------------------------------- main

if __name__ == "__main__":
    # nn.Parameter(torch.tensor(0.0)) initializes at 0.0; use a nonzero value here
    # so the bl path of the kernel is actually exercised by the numeric check.
    trust_degree = jnp.float32(0.25)

    N, M, D = 4, 1024, 128  # list of N critic outputs, each (M, D)
    key = jax.random.PRNGKey(0)
    k_obj, k_bl = jax.random.split(key)
    obj_of_nns = [jax.random.normal(jax.random.fold_in(k_obj, i), (M, D), jnp.float32)
                  for i in range(N)]
    bl_val_detached_list = [jax.random.normal(jax.random.fold_in(k_bl, i), (M, D), jnp.float32)
                            for i in range(N)]

    mean_detached, mean, td_out = critic_construct(
        obj_of_nns, bl_val_detached_list, trust_degree)
    jax.block_until_ready((mean_detached, mean, td_out))

    # Pure-JAX reference (original, unfused formula).
    ref = jnp.mean(jnp.stack(obj_of_nns)
                   - trust_degree * jnp.stack(bl_val_detached_list), axis=0)
    assert mean.shape == (M, D)
    assert jnp.allclose(mean, ref, rtol=1e-5, atol=1e-5)
    assert jnp.allclose(mean_detached, ref, rtol=1e-5, atol=1e-5)
    assert jnp.allclose(td_out, trust_degree)

    # Gradient sanity check (custom_vjp): d/d_td sum(mean) == -sum(mean(bl, 0)).
    grad_td = jax.grad(
        lambda td: jnp.sum(critic_construct(obj_of_nns, bl_val_detached_list, td)[1])
    )(trust_degree)
    expected_grad = -jnp.sum(jnp.stack(bl_val_detached_list).mean(axis=0))
    assert jnp.allclose(grad_td, expected_grad, rtol=1e-4, atol=1e-2)

    print("KERNEL_OK")
</pallas_src>

<mosaic_0001>
module attributes {stable_mosaic.version = 11 : i64} {
  func.func @kernel(%arg0: i32, %arg1: memref<2xf32, #tpu.memory_space<smem>>, %arg2: memref<512x128xf32, #tpu.memory_space<vmem>>, %arg3: memref<512x128xf32, #tpu.memory_space<vmem>>, %arg4: memref<512x128xf32, #tpu.memory_space<vmem>>, %arg5: memref<512x128xf32, #tpu.memory_space<vmem>>, %arg6: memref<512x128xf32, #tpu.memory_space<vmem>>, %arg7: memref<512x128xf32, #tpu.memory_space<vmem>>, %arg8: memref<512x128xf32, #tpu.memory_space<vmem>>, %arg9: memref<512x128xf32, #tpu.memory_space<vmem>>, %arg10: memref<512x128xf32, #tpu.memory_space<vmem>>) attributes {dimension_semantics = [#tpu.dimension_semantics<parallel>], iteration_bounds = array<i64: 2>, scalar_prefetch = 0 : i64, scratch_operands = 0 : i64, tpu.core_type = #tpu.core_type<tc>, window_params = [{transform_indices = @transform_0, window_bounds = array<i64: 2>}, {transform_indices = @transform_1, window_bounds = array<i64: 512, 128>}, {transform_indices = @transform_2, window_bounds = array<i64: 512, 128>}, {transform_indices = @transform_3, window_bounds = array<i64: 512, 128>}, {transform_indices = @transform_4, window_bounds = array<i64: 512, 128>}, {transform_indices = @transform_5, window_bounds = array<i64: 512, 128>}, {transform_indices = @transform_6, window_bounds = array<i64: 512, 128>}, {transform_indices = @transform_7, window_bounds = array<i64: 512, 128>}, {transform_indices = @transform_8, window_bounds = array<i64: 512, 128>}, {transform_indices = @transform_9, window_bounds = array<i64: 512, 128>}]} {
    %c0 = arith.constant 0 : index
    %0 = memref.load %arg1[%c0] : memref<2xf32, #tpu.memory_space<smem>>
    %c1 = arith.constant 1 : index
    %1 = memref.load %arg1[%c1] : memref<2xf32, #tpu.memory_space<smem>>
    %c0_0 = arith.constant 0 : index
    %c0_1 = arith.constant 0 : index
    %2 = vector.load %arg2[%c0_0, %c0_1] : memref<512x128xf32, #tpu.memory_space<vmem>>, vector<512x128xf32>
    %c0_2 = arith.constant 0 : index
    %c0_3 = arith.constant 0 : index
    %3 = vector.load %arg3[%c0_2, %c0_3] : memref<512x128xf32, #tpu.memory_space<vmem>>, vector<512x128xf32>
    %4 = arith.addf %2, %3 : vector<512x128xf32>
    %c0_4 = arith.constant 0 : index
    %c0_5 = arith.constant 0 : index
    %5 = vector.load %arg4[%c0_4, %c0_5] : memref<512x128xf32, #tpu.memory_space<vmem>>, vector<512x128xf32>
    %6 = arith.addf %4, %5 : vector<512x128xf32>
    %c0_6 = arith.constant 0 : index
    %c0_7 = arith.constant 0 : index
    %7 = vector.load %arg5[%c0_6, %c0_7] : memref<512x128xf32, #tpu.memory_space<vmem>>, vector<512x128xf32>
    %8 = arith.addf %6, %7 : vector<512x128xf32>
    %c0_8 = arith.constant 0 : index
    %c0_9 = arith.constant 0 : index
    %9 = vector.load %arg6[%c0_8, %c0_9] : memref<512x128xf32, #tpu.memory_space<vmem>>, vector<512x128xf32>
    %c0_10 = arith.constant 0 : index
    %c0_11 = arith.constant 0 : index
    %10 = vector.load %arg7[%c0_10, %c0_11] : memref<512x128xf32, #tpu.memory_space<vmem>>, vector<512x128xf32>
    %11 = arith.addf %9, %10 : vector<512x128xf32>
    %c0_12 = arith.constant 0 : index
    %c0_13 = arith.constant 0 : index
    %12 = vector.load %arg8[%c0_12, %c0_13] : memref<512x128xf32, #tpu.memory_space<vmem>>, vector<512x128xf32>
    %13 = arith.addf %11, %12 : vector<512x128xf32>
    %c0_14 = arith.constant 0 : index
    %c0_15 = arith.constant 0 : index
    %14 = vector.load %arg9[%c0_14, %c0_15] : memref<512x128xf32, #tpu.memory_space<vmem>>, vector<512x128xf32>
    %15 = arith.addf %13, %14 : vector<512x128xf32>
    %16 = vector.broadcast %0 : f32 to vector<512x128xf32>
    %17 = arith.mulf %16, %8 : vector<512x128xf32>
    %18 = vector.broadcast %1 : f32 to vector<512x128xf32>
    %19 = arith.mulf %18, %15 : vector<512x128xf32>
    %20 = arith.subf %17, %19 : vector<512x128xf32>
    %c0_16 = arith.constant 0 : index
    %c0_17 = arith.constant 0 : index
    %21 = vector.load %arg10[%c0_16, %c0_17] : memref<512x128xf32, #tpu.memory_space<vmem>>, vector<512x128xf32>
    tpu.vector_store %arg10[%c0_16, %c0_17], %20 {strides = array<i32>} : memref<512x128xf32, #tpu.memory_space<vmem>>, vector<512x128xf32>,
    return
  }
  func.func @transform_0(%arg0: i32) -> i32 {
    %c0_i32 = arith.constant 0 : i32
    %c0_i32_0 = arith.constant 0 : i32
    return %c0_i32 : i32
  }
  func.func @transform_1(%arg0: i32) -> (i32, i32) {
    %c0_i32 = arith.constant 0 : i32
    %c0_i32_0 = arith.constant 0 : i32
    return %arg0, %c0_i32 : i32, i32
  }
  func.func @transform_2(%arg0: i32) -> (i32, i32) {
    %c0_i32 = arith.constant 0 : i32
    %c0_i32_0 = arith.constant 0 : i32
    return %arg0, %c0_i32 : i32, i32
  }
  func.func @transform_3(%arg0: i32) -> (i32, i32) {
    %c0_i32 = arith.constant 0 : i32
    %c0_i32_0 = arith.constant 0 : i32
    return %arg0, %c0_i32 : i32, i32
  }
  func.func @transform_4(%arg0: i32) -> (i32, i32) {
    %c0_i32 = arith.constant 0 : i32
    %c0_i32_0 = arith.constant 0 : i32
    return %arg0, %c0_i32 : i32, i32
  }
  func.func @transform_5(%arg0: i32) -> (i32, i32) {
    %c0_i32 = arith.constant 0 : i32
    %c0_i32_0 = arith.constant 0 : i32
    return %arg0, %c0_i32 : i32, i32
  }
  func.func @transform_6(%arg0: i32) -> (i32, i32) {
    %c0_i32 = arith.constant 0 : i32
    %c0_i32_0 = arith.constant 0 : i32
    return %arg0, %c0_i32 : i32, i32
  }
  func.func @transform_7(%arg0: i32) -> (i32, i32) {
    %c0_i32 = arith.constant 0 : i32
    %c0_i32_0 = arith.constant 0 : i32
    return %arg0, %c0_i32 : i32, i32
  }
  func.func @transform_8(%arg0: i32) -> (i32, i32) {
    %c0_i32 = arith.constant 0 : i32
    %c0_i32_0 = arith.constant 0 : i32
    return %arg0, %c0_i32 : i32, i32
  }
  func.func @transform_9(%arg0: i32) -> (i32, i32) {
    %c0_i32 = arith.constant 0 : i32
    %c0_i32_0 = arith.constant 0 : i32
    return %arg0, %c0_i32 : i32, i32
  }
}

</mosaic_0001>

<bundles_post_ra>
// kernel: tpu_custom_call.1
= control target key start
LH: loop header
LB: loop body
LE: loop exit
PB: predicated region body
PF: predicated region fallthrough
CT: control target
= control target key end

     0   :  { %s3680_s0 = inlined_call_operand.hbm [shape: f32[2], index: 0, kind: input, shape index: {}]   ;;  %s3681_s1 = inlined_call_operand.hbm [shape: f32[1024,128], index: 1, kind: input, shape index: {}]   ;;  %s3682_s2 = inlined_call_operand.hbm [shape: f32[1024,128], index: 2, kind: input, shape index: {}]   ;;  %s3683_s3 = inlined_call_operand.hbm [shape: f32[1024,128], index: 3, kind: input, shape index: {}]   ;;  %s3684_s4 = inlined_call_operand.hbm [shape: f32[1024,128], index: 4, kind: input, shape index: {}]   ;;  %s3685_s5 = inlined_call_operand.hbm [shape: f32[1024,128], index: 5, kind: input, shape index: {}]   ;;  %s3686_s6 = inlined_call_operand.hbm [shape: f32[1024,128], index: 6, kind: input, shape index: {}]   ;;  %s3687_s7 = inlined_call_operand.hbm [shape: f32[1024,128], index: 7, kind: input, shape index: {}]   ;;  %s3688_s8 = inlined_call_operand.hbm [shape: f32[1024,128], index: 8, kind: input, shape index: {}]   ;;  %s3689_s9 = inlined_call_operand.hbm [shape: f32[1024,128], index: 9, kind: output, shape index: {}]  }
   0x1   :  { %3705 = sst [smem:[#allocation29_spill]] %s3680_s0 }
   0x2   :  { %3706 = sst [smem:[#allocation30_spill]] %s3681_s1 }
   0x3   :  { %3707 = sst [smem:[#allocation31_spill]] %s3682_s2 }
   0x4   :  { %3708 = sst [smem:[#allocation32_spill]] %s3683_s3 }
   0x5   :  { %3709 = sst [smem:[#allocation33_spill]] %s3684_s4 }
   0x6   :  { %3710 = sst [smem:[#allocation34_spill]] %s3685_s5 }
   0x7   :  { %3711 = sst [smem:[#allocation35_spill]] %s3686_s6 }
   0x8   :  { %3712 = sst [smem:[#allocation36_spill]] %s3687_s7 }
   0x9   :  { %3713 = sst [smem:[#allocation37_spill]] %s3688_s8 }
   0xa   :  { %3714 = sst [smem:[#allocation38_spill]] %s3689_s9 }
   0xb   :  { %14 = vsyncpa [#allocation5], 0 }
   0xc   :  { %15 = vsyncpa [#allocation3], 0 }
   0xd   :  { %17 = vsyncpa [#allocation3 + $0x1], 0 }
   0xe   :  { %18 = vsyncpa [#allocation8], 0 }
   0xf   :  { %20 = vsyncpa [#allocation8 + $0x1], 0 }
  0x10   :  { %21 = vsyncpa [#allocation11], 0 }
  0x11   :  { %23 = vsyncpa [#allocation11 + $0x1], 0 }
  0x12   :  { %24 = vsyncpa [#allocation14], 0 }
  0x13   :  { %26 = vsyncpa [#allocation14 + $0x1], 0 }
  0x14   :  { %27 = vsyncpa [#allocation17], 0 }
  0x15   :  { %29 = vsyncpa [#allocation17 + $0x1], 0 }
  0x16   :  { %30 = vsyncpa [#allocation4], 0 }
  0x17   :  { %32 = vsyncpa [#allocation4 + $0x1], 0  ;;  %s2618_s30 = smov 0   ;;  %s2620_s10 = smov 0  }
  0x18   :  { %s2622_s11 = smov 0   ;;  %s2624_s12 = smov 0  }
  0x19 LB: > { %3715 = sst [smem:[#allocation26_spill]] %s2557_s11  ;;  %s2639_s13 = sadd.s32 1, %s2561_s12   ;;  %s2561_s12 = sphi %s2624_s12, %s3743_s12   ;;  %s2557_s11 = sphi %s2622_s11, %s3745_s11   ;;  %s2553_s10 = sphi %s2620_s10, %s3747_s10   ;;  %s2549_s30 = sphi %s2618_s30, %s3746_s30  }
  0x1a   : > { %3716 = sst [smem:[#allocation27_spill]] %s2639_s13  ;;  %s66_s14 = sadd.s32 1, %s2557_s11 }
  0x1b   : > { %s63_s15 = ssub.s32 %s2561_s12, %s2639_s13  ;;  %p73_p0 = scmp.ne.s32.totalorder %s2557_s11, %s2553_s10 }
  0x1c   : > { %p64_p1 = scmp.eq.s32.totalorder %s63_s15, 0  ;;  %p74_p2 = scmp.eq.s32.totalorder %s2561_s12, 0 }
  0x1d   : > { %p2180_p4 = scmp.lt.s32.totalorder %s2561_s12, 2  ;;  %s2656_s17 = sand.u32 1, %s2557_s11  }
  0x1e   : > { %s2650_s16 = scalar_select %p64_p1, %s2557_s11, %s66_s14  }
  0x1f   : > { %p75_p5 = por %p74_p2, %p73_p0  ;;  %s2659_s18 = sshll.u32 %s2656_s17, 9 }
  0x20   : > { %3717 = sst [smem:[#allocation28_spill]] %s2650_s16  ;;  %s2662_s19 = sshll.u32 %s2561_s12, 9 }
  0x21   : > { %p2664_p6 = pnand %p2180_p4, %p75_p5  ;;  %s2669_s21 = sand.u32 1, %s2561_s12  }
  0x22   : > { %s3719_s2 = sld [smem:[#allocation31_spill]]  ;;  %s347_s26 = scalar_lea.vmem [#allocation7], %s2659_s18 }
  0x23   : > { %s355_s27 = sshll.u32 %s347_s26, 4  ;;  %p2679_p8 = pneg %p2664_p6  ;;  %s356_s27 = int_to_ptr.vmem [resolvable:$true] %s355_s27 }
  0x28   : > { %s352_s24 = scalar_lea.hbm %s3719_s2, %s2662_s19 }
  0x29   : > { %s353_s25 = sshll.u32 %s352_s24, 4  ;;  %s2227_s24 = scalar_lea.hbm %s3719_s2, 1024  ;;  %s354_s25 = int_to_ptr.hbm [resolvable:$true] %s353_s25 }
  0x2a   : > { %s2220_s29 = sshra.s32 %s354_s25, 4  ;;  %s2221_s29 = int_to_ptr.hbm [resolvable:$true] %s2220_s29 }
  0x2b   : > { %s2222_s14 = scalar_lea.hbm %s2221_s29, 512  ;;  %p2228_p11 = scmp.lt.s32.totalorder %s2221_s29, %s3719_s2 }
  0x2c   : > { %p2223_p7 = scmp.ne.s32.totalorder %s2221_s29, %s2222_s14  ;;  %p2229_p12 = scmp.lt.s32.totalorder %s2227_s24, %s2222_s14 }
  0x2e   : > { %p2225_p9 = pnand %p2679_p8, %p2223_p7  ;;  %p2230_p13 = por %p2229_p12, %p2228_p11 }
  0x30   : > { %p2226_p10 = pneg %p2225_p9 }
  0x32   : > { %p2231_p1 = pnand %p2230_p13, %p2226_p10 }
  0x34   : > { %2234 = shalt.err (!%p2231_p1)
}
  0x35   : > { %s3698_s28 = smov 128   ;;  %s3700_s13 = smov 8  }
  0x36   : > { %s3721_s22 = scalar_lea.sflag [#allocation8], %s2669_s21  ;;  %s3722_s4 = sld [smem:[#allocation33_spill]] }
  0x37   : > { %2156 = dma.hbm_to_vmem [thread:$0]  (!%p2664_p6), %s354_s25, 8192, %s356_s27, %s3721_s22, %s3698_s28, %s3698_s28, %s3700_s13  }
  0x38   : > { %s391_s23 = scalar_lea.vmem [#allocation10], %s2659_s18  ;;  %s3697_s2 = scalar_lea.sflag [#allocation11], %s2669_s21 }
  0x39   : > { %s399_s24 = sshll.u32 %s391_s23, 4  ;;  %s400_s24 = int_to_ptr.vmem [resolvable:$true] %s399_s24 }
  0x3c   : > { %s396_s14 = scalar_lea.hbm %s3722_s4, %s2662_s19  ;;  %s2257_s25 = scalar_lea.hbm %s3722_s4, 1024 }
  0x3d   : > { %s397_s26 = sshll.u32 %s396_s14, 4  ;;  %s398_s26 = int_to_ptr.hbm [resolvable:$true] %s397_s26 }
  0x3e   : > { %s2250_s9 = sshra.s32 %s398_s26, 4  ;;  %s2251_s9 = int_to_ptr.hbm [resolvable:$true] %s2250_s9 }
  0x3f   : > { %s2252_s8 = scalar_lea.hbm %s2251_s9, 512  ;;  %p2258_p7 = scmp.lt.s32.totalorder %s2251_s9, %s3722_s4 }
  0x40   : > { %p2253_p2 = scmp.ne.s32.totalorder %s2251_s9, %s2252_s8  ;;  %p2259_p9 = scmp.lt.s32.totalorder %s2257_s25, %s2252_s8 }
  0x42   : > { %p2255_p4 = pnand %p2253_p2, %p2679_p8  ;;  %p2260_p10 = por %p2259_p9, %p2258_p7 }
  0x44   : > { %p2256_p5 = pneg %p2255_p4 }
  0x46   : > { %p2261_p11 = pnand %p2260_p10, %p2256_p5 }
  0x48   : > { %2264 = shalt.err (!%p2261_p11)
}
  0x49   : > { %2162 = dma.hbm_to_vmem [thread:$0]  (!%p2664_p6), %s398_s26, 8192, %s400_s24, %s3697_s2, %s3698_s28, %s3698_s28, %s3700_s13  }
  0x4a   : > { %s3723_s6 = sld [smem:[#allocation35_spill]]  ;;  %s435_s16 = scalar_lea.vmem [#allocation13], %s2659_s18 }
  0x4b   : > { %s443_s29 = sshll.u32 %s435_s16, 4  ;;  %s3696_s14 = scalar_lea.sflag [#allocation14], %s2669_s21  ;;  %s444_s29 = int_to_ptr.vmem [resolvable:$true] %s443_s29 }
  0x50   : > { %s440_s9 = scalar_lea.hbm %s3723_s6, %s2662_s19  ;;  %s2287_s24 = scalar_lea.hbm %s3723_s6, 1024 }
  0x51   : > { %s441_s8 = sshll.u32 %s440_s9, 4  ;;  %s442_s8 = int_to_ptr.hbm [resolvable:$true] %s441_s8 }
  0x52   : > { %s2280_s23 = sshra.s32 %s442_s8, 4  ;;  %s2281_s23 = int_to_ptr.hbm [resolvable:$true] %s2280_s23 }
  0x53   : > { %s2282_s25 = scalar_lea.hbm %s2281_s23, 512  ;;  %p2288_p2 = scmp.lt.s32.totalorder %s2281_s23, %s3723_s6 }
  0x54   : > { %p2283_p12 = scmp.ne.s32.totalorder %s2281_s23, %s2282_s25  ;;  %p2289_p4 = scmp.lt.s32.totalorder %s2287_s24, %s2282_s25 }
  0x56   : > { %p2285_p13 = pnand %p2283_p12, %p2679_p8  ;;  %p2290_p5 = por %p2289_p4, %p2288_p2 }
  0x58   : > { %p2286_p1 = pneg %p2285_p13 }
  0x5a   : > { %p2291_p7 = pnand %p2290_p5, %p2286_p1 }
  0x5c   : > { %2294 = shalt.err (!%p2291_p7)
}
  0x5d   : > { %2168 = dma.hbm_to_vmem [thread:$0]  (!%p2664_p6), %s442_s8, 8192, %s444_s29, %s3696_s14, %s3698_s28, %s3698_s28, %s3700_s13  }
  0x5e   : > { %s2741_s7 = sadd.s32 4294967295, %s2561_s12   ;;  %s2070_s9 = sadd.s32 4294967294, %s2561_s12  }
  0x5f   : > { %p79_p9 = scmp.ne.s32.totalorder %s2553_s10, %s2549_s30  ;;  %p3703_p10 = scmp.eq.s32.totalorder %s2741_s7, 0 }
  0x60   : > { %p285_p11 = scmp.eq.s32.totalorder %s2741_s7, 1  ;;  %p291_p12 = scmp.eq.s32.totalorder %s2070_s9, 1 }
  0x61   : > { %p2750_p13 = por %p3703_p10, %p79_p9  ;;  %p2071_p1 = scmp.ge.s32.totalorder %s2561_s12, 1 }
  0x62   : > { %p2758_p2 = por %p285_p11, %p73_p0  ;;  %p2762_p4 = por %p291_p12, %p79_p9 }
  0x63   : > { %p298_p5 = scmp.lt.s32.totalorder %s2561_s12, 3  ;;  %s3727_s0 = sld [smem:[#allocation29_spill]] }
  0x64   : > { %s3729_s1 = sld [smem:[#allocation30_spill]]  ;;  %s325_s14 = scalar_lea.vmem [#allocation6], %s2659_s18 }
  0x65   : > { %p2770_p7 = pnand %p2071_p1, %p298_p5  ;;  %s333_s2 = sshll.u32 %s325_s14, 4  ;;  %s334_s2 = int_to_ptr.vmem [resolvable:$true] %s333_s2 }
  0x66   : > { %s3730_s3 = sld [smem:[#allocation32_spill]]  ;;  %s2565_s13 = smov [#allocation2]  }
  0x67   : > { %p2146_p0 = pneg %p2770_p7 }
  0x69   : > { %s310_s27 = sshll.u32 %s3727_s0, 4  ;;  %p2147_p9 = pnand %p2146_p0, %p3703_p10  ;;  %s311_s27 = int_to_ptr.hbm [resolvable:$true] %s310_s27 }
  0x6a   : > { %s330_s5 = scalar_lea.hbm %s3729_s1, %s2662_s19  ;;  %s322_s0 = scalar_lea.sflag [#allocation3], %s2656_s17 }
  0x6b   : > { %s331_s9 = sshll.u32 %s330_s5, 4  ;;  %s2332_s26 = scalar_lea.hbm %s3729_s1, 1024  ;;  %s332_s9 = int_to_ptr.hbm [resolvable:$true] %s331_s9 }
  0x6c   : > { %s374_s28 = scalar_lea.hbm %s3730_s3, %s2662_s19  ;;  %s2325_s4 = sshra.s32 %s332_s9, 4  ;;  %s2326_s4 = int_to_ptr.hbm [resolvable:$true] %s2325_s4 }
  0x6d   : > { %2149 = dma.hbm_to_smem (!%p2147_p9), %s311_s27, 16, %s2565_s13, [#allocation5]  }
  0x6e   : > { %s2327_s6 = scalar_lea.hbm %s2326_s4, 512  ;;  %p2333_p5 = scmp.lt.s32.totalorder %s2326_s4, %s3729_s1 }
  0x6f   : > { %p2328_p11 = scmp.ne.s32.totalorder %s2326_s4, %s2327_s6  ;;  %p2334_p0 = scmp.lt.s32.totalorder %s2332_s26, %s2327_s6 }
  0x71   : > { %p2330_p12 = pnand %p2328_p11, %p2679_p8  ;;  %p2335_p3 = por %p2334_p0, %p2333_p5 }
  0x73   : > { %p2331_p1 = pneg %p2330_p12 }
  0x75   : > { %p2336_p10 = pnand %p2335_p3, %p2331_p1 }
  0x77   : > { %2339 = shalt.err (!%p2336_p10)
}
  0x78   : > { %s3731_s13 = smov 8   ;;  %s3732_s27 = smov 128  }
  0x79   : > { %2153 = dma.hbm_to_vmem [thread:$0]  (!%p2664_p6), %s332_s9, 8192, %s334_s2, %s322_s0, %s3732_s27, %s3732_s27, %s3731_s13  }
  0x7a   : > { %s375_s23 = sshll.u32 %s374_s28, 4  ;;  %s369_s25 = scalar_lea.vmem [#allocation9], %s2659_s18  ;;  %s376_s23 = int_to_ptr.hbm [resolvable:$true] %s375_s23 }
  0x7b   : > { %s377_s24 = sshll.u32 %s369_s25, 4  ;;  %s2355_s14 = sshra.s32 %s376_s23, 4  ;;  %s378_s24 = int_to_ptr.vmem [resolvable:$true] %s377_s24  ;;  %s2356_s14 = int_to_ptr.hbm [resolvable:$true] %s2355_s14 }
  0x7c   : > { %s2357_s4 = scalar_lea.hbm %s2356_s14, 512  ;;  %s2362_s26 = scalar_lea.hbm %s3730_s3, 1024 }
  0x7d   : > { %p2358_p9 = scmp.ne.s32.totalorder %s2356_s14, %s2357_s4  ;;  %p2363_p11 = scmp.lt.s32.totalorder %s2356_s14, %s3730_s3 }
  0x7e   : > { %p2364_p12 = scmp.lt.s32.totalorder %s2362_s26, %s2357_s4 }
  0x7f   : > { %p2360_p3 = pnand %p2358_p9, %p2679_p8 }
  0x80   : > { %p2365_p1 = por %p2364_p12, %p2363_p11 }
  0x81   : > { %p2361_p10 = pneg %p2360_p3 }
  0x83   : > { %p2366_p5 = pnand %p2365_p1, %p2361_p10 }
  0x85   : > { %2369 = shalt.err (!%p2366_p5)
}
  0x86   : > { %s3733_s0 = scalar_lea.sflag [#allocation8], %s2669_s21  ;;  %s3734_s9 = sld [smem:[#allocation34_spill]] }
  0x87   : > { %2159 = dma.hbm_to_vmem [thread:$0]  (!%p2664_p6), %s376_s23, 8192, %s378_s24, %s3733_s0, %s3732_s27, %s3732_s27, %s3731_s13  }
  0x88   : > { %s413_s14 = scalar_lea.vmem [#allocation12], %s2659_s18 }
  0x89   : > { %s421_s4 = sshll.u32 %s413_s14, 4  ;;  %s422_s4 = int_to_ptr.vmem [resolvable:$true] %s421_s4 }
  0x8c   : > { %s418_s1 = scalar_lea.hbm %s3734_s9, %s2662_s19  ;;  %s2392_s23 = scalar_lea.hbm %s3734_s9, 1024 }
  0x8d   : > { %s419_s25 = sshll.u32 %s418_s1, 4  ;;  %s420_s25 = int_to_ptr.hbm [resolvable:$true] %s419_s25 }
  0x8e   : > { %s2385_s6 = sshra.s32 %s420_s25, 4  ;;  %s2386_s6 = int_to_ptr.hbm [resolvable:$true] %s2385_s6 }
  0x8f   : > { %s2387_s11 = scalar_lea.hbm %s2386_s6, 512  ;;  %p2393_p10 = scmp.lt.s32.totalorder %s2386_s6, %s3734_s9 }
  0x90   : > { %p2388_p0 = scmp.ne.s32.totalorder %s2386_s6, %s2387_s11  ;;  %p2394_p11 = scmp.lt.s32.totalorder %s2392_s23, %s2387_s11 }
  0x92   : > { %p2390_p9 = pnand %p2388_p0, %p2679_p8  ;;  %p2395_p12 = por %p2394_p11, %p2393_p10 }
  0x94   : > { %p2391_p3 = pneg %p2390_p9 }
  0x96   : > { %p2396_p1 = pnand %p2395_p12, %p2391_p3 }
  0x98   : > { %2399 = shalt.err (!%p2396_p1)
}
  0x99   : > { %s3735_s2 = scalar_lea.sflag [#allocation11], %s2669_s21  ;;  %s3736_s14 = sld [smem:[#allocation36_spill]] }
  0x9a   : > { %2165 = dma.hbm_to_vmem [thread:$0]  (!%p2664_p6), %s420_s25, 8192, %s422_s4, %s3735_s2, %s3732_s27, %s3732_s27, %s3731_s13  }
  0x9b   : > { %s457_s11 = scalar_lea.vmem [#allocation15], %s2659_s18 }
  0x9c   : > { %s465_s5 = sshll.u32 %s457_s11, 4  ;;  %s466_s5 = int_to_ptr.vmem [resolvable:$true] %s465_s5 }
  0x9f   : > { %s462_s26 = scalar_lea.hbm %s3736_s14, %s2662_s19  ;;  %s2422_s25 = scalar_lea.hbm %s3736_s14, 1024 }
  0xa0   : > { %s463_s6 = sshll.u32 %s462_s26, 4  ;;  %s464_s6 = int_to_ptr.hbm [resolvable:$true] %s463_s6 }
  0xa1   : > { %s2415_s23 = sshra.s32 %s464_s6, 4  ;;  %s2416_s23 = int_to_ptr.hbm [resolvable:$true] %s2415_s23 }
  0xa2   : > { %s2417_s24 = scalar_lea.hbm %s2416_s23, 512  ;;  %p2423_p3 = scmp.lt.s32.totalorder %s2416_s23, %s3736_s14 }
  0xa3   : > { %p2418_p5 = scmp.ne.s32.totalorder %s2416_s23, %s2417_s24  ;;  %p2424_p10 = scmp.lt.s32.totalorder %s2422_s25, %s2417_s24 }
  0xa5   : > { %p2420_p0 = pnand %p2418_p5, %p2679_p8  ;;  %p2425_p11 = por %p2424_p10, %p2423_p3 }
  0xa7   : > { %p2421_p9 = pneg %p2420_p0 }
  0xa9   : > { %p2426_p12 = pnand %p2425_p11, %p2421_p9 }
  0xab   : > { %2429 = shalt.err (!%p2426_p12)
}
  0xac   : > { %s3737_s28 = scalar_lea.sflag [#allocation14], %s2669_s21  ;;  %s3738_s26 = sld [smem:[#allocation37_spill]] }
  0xad   : > { %2171 = dma.hbm_to_vmem [thread:$0]  (!%p2664_p6), %s464_s6, 8192, %s466_s5, %s3737_s28, %s3732_s27, %s3732_s27, %s3731_s13  }
  0xae   : > { %s479_s23 = scalar_lea.vmem [#allocation16], %s2659_s18  ;;  %s476_s25 = scalar_lea.sflag [#allocation17], %s2656_s17 }
  0xaf   : > { %s487_s24 = sshll.u32 %s479_s23, 4  ;;  %s488_s24 = int_to_ptr.vmem [resolvable:$true] %s487_s24 }
  0xb2   : > { %s484_s11 = scalar_lea.hbm %s3738_s26, %s2662_s19  ;;  %s2452_s6 = scalar_lea.hbm %s3738_s26, 1024 }
  0xb3   : > { %s485_s0 = sshll.u32 %s484_s11, 4  ;;  %s486_s0 = int_to_ptr.hbm [resolvable:$true] %s485_s0 }
  0xb4   : > { %s2445_s4 = sshra.s32 %s486_s0, 4  ;;  %s2446_s4 = int_to_ptr.hbm [resolvable:$true] %s2445_s4 }
  0xb5   : > { %s2447_s2 = scalar_lea.hbm %s2446_s4, 512  ;;  %p2453_p9 = scmp.lt.s32.totalorder %s2446_s4, %s3738_s26 }
  0xb6   : > { %p2448_p1 = scmp.ne.s32.totalorder %s2446_s4, %s2447_s2  ;;  %p2454_p3 = scmp.lt.s32.totalorder %s2452_s6, %s2447_s2 }
  0xb8   : > { %p2450_p5 = pnand %p2448_p1, %p2679_p8  ;;  %p2455_p10 = por %p2454_p3, %p2453_p9 }
  0xba   : > { %p2451_p0 = pneg %p2450_p5 }
  0xbc   : > { %p2456_p11 = pnand %p2455_p10, %p2451_p0 }
  0xbe   : > { %2459 = shalt.err (!%p2456_p11)
}
  0xbf   : > { %2174 = dma.hbm_to_vmem [thread:$0]  (!%p2664_p6), %s486_s0, 8192, %s488_s24, %s476_s25, %s3732_s27, %s3732_s27, %s3731_s13  }
  0xc0   : > { %499 = sbr.rel (%p2770_p7) target bundleno = 402 (0x192), region = 56  ;;  %p3739_p8 = scmp.eq.s32.totalorder (!%p2770_p7), %s2741_s7, 0 }
  0xc5   : > { %2520 = dma.done.wait (%p3739_p8), [#allocation5], 16   ;;  %p3740_p12 = pmov %p3739_p8 }
  0xc6   : > { %s2883_s17 = sand.u32 1, %s2553_s10  }
  0xc7   : > { %2522 = vsyncadd (%p3740_p12), [#allocation5], 4294967280  ;;  %s2886_s18 = sshll.u32 %s2883_s17, 9  ;;  %s507_s19 = scalar_lea.sflag [#allocation3], %s2883_s17 }
  0xc8   : > { %s2890_s20 = scalar_lea.vmem [#allocation6], %s2886_s18 }
  0xc9   : > { %2524 = dma.done.wait (%p2750_p13), %s507_s19, 8192  }
  0xca   : > { %2526 = vsyncadd (%p2750_p13), %s507_s19, 4294959104  ;;  %s516_s15 = sand.u32 1, %s2741_s7   ;;  %s2898_s13 = scalar_lea.vmem [#allocation7], %s2886_s18 }
  0xcb   : > { %s517_s22 = scalar_lea.sflag [#allocation8], %s516_s15 }
  0xcc   : > { %2528 = dma.done.wait (%p2750_p13), %s517_s22, 16384  }
  0xcd   : > { %2530 = vsyncadd (%p2750_p13), %s517_s22, 4294950912  ;;  %s2905_s27 = scalar_lea.vmem [#allocation9], %s2886_s18  ;;  %s537_s9 = scalar_lea.sflag [#allocation11], %s516_s15 }
  0xce   : > { %s2908_s3 = scalar_lea.vmem [#allocation10], %s2886_s18 }
  0xcf   : > { %2532 = dma.done.wait (%p2750_p13), %s537_s9, 16384  }
  0xd0   : > { %2534 = vsyncadd (%p2750_p13), %s537_s9, 4294950912  ;;  %s2915_s1 = scalar_lea.vmem [#allocation12], %s2886_s18  ;;  %s557_s11 = scalar_lea.sflag [#allocation14], %s516_s15 }
  0xd1   : > { %s2918_s23 = scalar_lea.vmem [#allocation13], %s2886_s18 }
  0xd2   : > { %2536 = dma.done.wait (%p2750_p13), %s557_s11, 16384  }
  0xd3   : > { %2538 = vsyncadd (%p2750_p13), %s557_s11, 4294950912  ;;  %s2925_s24 = scalar_lea.vmem [#allocation15], %s2886_s18  ;;  %s577_s0 = scalar_lea.sflag [#allocation17], %s2883_s17 }
  0xd4   : > { %s2929_s25 = scalar_lea.vmem [#allocation16], %s2886_s18 }
  0xd5   : > { %2540 = dma.done.wait (%p2750_p13), %s577_s0, 8192  }
  0xd6   : > { %2542 = vsyncadd (%p2750_p13), %s577_s0, 4294959104 }
  0xd7   : > { %586 = sfence }
  0xd8   : > { %s661_s4 = sld [smem:[#allocation2]]  ;;  %v663_v0 = vld [vmem:[%s2890_s20] sm:$0xff]  ;;  %v664_v9 = vld [vmem:[%s2890_s20 + $0x8] sm:$0xff]  ;;  %v665_v22 = vld [vmem:[%s2890_s20 + $0x10] sm:$0xff]  ;;  %s2979_s2 = scalar_lea.vmem [#allocation18], %s2886_s18 }
  0xd9   : > { %v727_v1 = vld [vmem:[%s2898_s13] sm:$0xff]  ;;  %s2109_s16 = sld [smem:[#allocation2 + $0x1]]  ;;  %v728_v12 = vld [vmem:[%s2898_s13 + $0x8] sm:$0xff]  ;;  %v729_v23 = vld [vmem:[%s2898_s13 + $0x10] sm:$0xff]  ;;  %s2123_s21 = sshll.u32 %s2741_s7, 9 }
  0xda   : > { %v855_v2 = vld [vmem:[%s2905_s27] sm:$0xff]  ;;  %v791_v3 = vadd.f32 %v727_v1, %v663_v0  ;;  %v856_v13 = vld [vmem:[%s2905_s27 + $0x8] sm:$0xff]  ;;  %v792_v15 = vadd.f32 %v728_v12, %v664_v9  ;;  %v793_v28 = vadd.f32 %v729_v23, %v665_v22  ;;  %v857_v29 = vld [vmem:[%s2905_s27 + $0x10] sm:$0xff]  ;;  %s3741_s5 = sld [smem:[#allocation38_spill]]  ;;  %s1830_s18 = sshll.u32 %s2979_s2, 4  ;;  %s1831_s18 = int_to_ptr.vmem [resolvable:$true] %s1830_s18 }
  0xdb   : > { %v1111_v4 = vld [vmem:[%s2915_s1] sm:$0xff]  ;;  %v1112_v16 = vld [vmem:[%s2915_s1 + $0x8] sm:$0xff]  ;;  %v1113_v30 = vld [vmem:[%s2915_s1 + $0x10] sm:$0xff] }
  0xdc   : > { %v1175_v5 = vld [vmem:[%s2918_s23] sm:$0xff]  ;;  %v919_v10 = vadd.f32 %v855_v2, %v791_v3  ;;  %v1176_v17 = vld [vmem:[%s2918_s23 + $0x8] sm:$0xff]  ;;  %v920_v26 = vadd.f32 %v856_v13, %v792_v15  ;;  %v985_v34 = vld [vmem:[%s2908_s3 + $0x10] sm:$0xff]  ;;  %v921_v39 = vadd.f32 %v857_v29, %v793_v28 }
  0xdd   : > { %v983_v6 = vld [vmem:[%s2908_s3] sm:$0xff]  ;;  %v1239_v7 = vadd.f32 %v1175_v5, %v1111_v4  ;;  %v1304_v18 = vld [vmem:[%s2925_s24 + $0x8] sm:$0xff]  ;;  %v1240_v21 = vadd.f32 %v1176_v17, %v1112_v16  ;;  %v1177_v35 = vld [vmem:[%s2918_s23 + $0x10] sm:$0xff] }
  0xde   : > { %v1303_v8 = vld [vmem:[%s2925_s24] sm:$0xff]  ;;  %v1047_v19 = vadd.f32 %v983_v6, %v919_v10  ;;  %v984_v20 = vld [vmem:[%s2908_s3 + $0x8] sm:$0xff]  ;;  %v2952_v25 = vstv %s661_s4  ;;  %v1305_v36 = vld [vmem:[%s2925_s24 + $0x10] sm:$0xff]  ;;  %v1241_v40 = vadd.f32 %v1177_v35, %v1113_v30  ;;  %v1049_v51 = vadd.f32 %v985_v34, %v921_v39 }
  0xdf   : > { %v1431_v11 = vld [vmem:[%s2929_s25] sm:$0xff]  ;;  %v1367_v14 = vadd.f32 %v1303_v8, %v1239_v7  ;;  %v1432_v27 = vld [vmem:[%s2929_s25 + $0x8] sm:$0xff]  ;;  %v2958_v32 = vstv %s2109_s16  ;;  %v1368_v33 = vadd.f32 %v1304_v18, %v1240_v21  ;;  %v1048_v38 = vadd.f32 %v984_v20, %v920_v26  ;;  %v666_v41 = vld [vmem:[%s2890_s20 + $0x18] sm:$0xff] }
  0xe0   : > { %v1560_v31 = vmul.f32 %v2952_v25, %v1047_v19  ;;  %v730_v42 = vld [vmem:[%s2898_s13 + $0x18] sm:$0xff]  ;;  %v1433_v45 = vld [vmem:[%s2929_s25 + $0x10] sm:$0xff]  ;;  %v1369_v52 = vadd.f32 %v1305_v36, %v1241_v40  ;;  %v667_v55 = vld [vmem:[%s2890_s20 + $0x20] sm:$0xff]  ;;  %v1562_v63 = vmul.f32 %v2952_v25, %v1049_v51  ;;  %s1829_s28 = scalar_lea.hbm %s3741_s5, %s2123_s21  ;;  %s2495_s9 = scalar_lea.hbm %s3741_s5, 1024 }
  0xe1   : > { %v1495_v24 = vadd.f32 %v1431_v11, %v1367_v14  ;;  %v858_v43 = vld [vmem:[%s2905_s27 + $0x18] sm:$0xff]  ;;  %v1496_v44 = vadd.f32 %v1432_v27, %v1368_v33  ;;  %v794_v46 = vadd.f32 %v730_v42, %v666_v41  ;;  %v1561_v50 = vmul.f32 %v2952_v25, %v1048_v38  ;;  %v731_v60 = vld [vmem:[%s2898_s13 + $0x20] sm:$0xff]  ;;  %v668_v9 = vld [vmem:[%s2890_s20 + $0x28] sm:$0xff]  ;;  %s1832_s19 = sshll.u32 %s1829_s28, 4  ;;  %s1833_s19 = int_to_ptr.hbm [resolvable:$true] %s1832_s19 }
  0xe2   : > { %v1114_v47 = vld [vmem:[%s2915_s1 + $0x18] sm:$0xff]  ;;  %v859_v61 = vld [vmem:[%s2905_s27 + $0x20] sm:$0xff]  ;;  %v1497_v62 = vadd.f32 %v1433_v45, %v1369_v52  ;;  %v795_v0 = vadd.f32 %v731_v60, %v667_v55  ;;  %v732_v10 = vld [vmem:[%s2898_s13 + $0x28] sm:$0xff]  ;;  %s2489_s15 = sshra.s32 %s1833_s19, 4  ;;  %s2490_s15 = int_to_ptr.hbm [resolvable:$true] %s2489_s15 }
  0xe3   : > { %v1625_v37 = vmul.f32 %v2958_v32, %v1495_v24  ;;  %v1178_v48 = vld [vmem:[%s2918_s23 + $0x18] sm:$0xff]  ;;  %v1626_v56 = vmul.f32 %v2958_v32, %v1496_v44  ;;  %v922_v57 = vadd.f32 %v858_v43, %v794_v46  ;;  %v1115_v1 = vld [vmem:[%s2915_s1 + $0x20] sm:$0xff]  ;;  %v796_v14 = vadd.f32 %v732_v10, %v668_v9  ;;  %v860_v15 = vld [vmem:[%s2905_s27 + $0x28] sm:$0xff]  ;;  %s2491_s22 = scalar_lea.hbm %s2490_s15, 512  ;;  %p2496_p1 = scmp.lt.s32.totalorder %s2490_s15, %s3741_s5 }
  0xe4   : > { %v986_v53 = vld [vmem:[%s2908_s3 + $0x18] sm:$0xff]  ;;  %v1242_v58 = vadd.f32 %v1178_v48, %v1114_v47  ;;  %v1179_v2 = vld [vmem:[%s2918_s23 + $0x20] sm:$0xff]  ;;  %v1627_v11 = vmul.f32 %v2958_v32, %v1497_v62  ;;  %v923_v12 = vadd.f32 %v859_v61, %v795_v0  ;;  %v1116_v16 = vld [vmem:[%s2915_s1 + $0x28] sm:$0xff]  ;;  %p2492_p6 = scmp.ne.s32.totalorder %s2490_s15, %s2491_s22  ;;  %p2497_p5 = scmp.lt.s32.totalorder %s2495_s9, %s2491_s22 }
  0xe5   : > { %v1689_v49 = vsub.f32 %v1560_v31, %v1625_v37  ;;  %v1306_v54 = vld [vmem:[%s2925_s24 + $0x18] sm:$0xff]  ;;  %v1307_v3 = vld [vmem:[%s2925_s24 + $0x20] sm:$0xff]  ;;  %v1690_v4 = vsub.f32 %v1561_v50, %v1626_v56  ;;  %v1050_v5 = vadd.f32 %v986_v53, %v922_v57  ;;  %v1243_v8 = vadd.f32 %v1179_v2, %v1115_v1  ;;  %v988_v20 = vld [vmem:[%s2908_s3 + $0x28] sm:$0xff] }
  0xe6   : > { %v1434_v59 = vld [vmem:[%s2929_s25 + $0x18] sm:$0xff]  ;;  %v1370_v6 = vadd.f32 %v1306_v54, %v1242_v58  ;;  %v987_v7 = vld [vmem:[%s2908_s3 + $0x20] sm:$0xff]  ;;  %v1180_v21 = vld [vmem:[%s2918_s23 + $0x28] sm:$0xff]  ;;  %v1691_v23 = vsub.f32 %v1562_v63, %v1627_v11  ;;  %v924_v26 = vadd.f32 %v860_v15, %v796_v14  ;;  %p2493_p13 = pnand %p2492_p6, %p2758_p2  ;;  %p2498_p0 = por %p2497_p5, %p2496_p1 }
  0xe7   : > { %1753 = vst [vmem:[%s2979_s2] sm:$0xff] %v1689_v49  ;;  %v1435_v13 = vld [vmem:[%s2929_s25 + $0x20] sm:$0xff]  ;;  %v1563_v18 = vmul.f32 %v2952_v25, %v1050_v5  ;;  %v1371_v19 = vadd.f32 %v1307_v3, %v1243_v8  ;;  %v1308_v22 = vld [vmem:[%s2925_s24 + $0x28] sm:$0xff]  ;;  %v1051_v24 = vadd.f32 %v987_v7, %v923_v12  ;;  %v1244_v27 = vadd.f32 %v1180_v21, %v1116_v16  ;;  %v669_v28 = vld [vmem:[%s2890_s20 + $0x30] sm:$0xff] }
  0xe8   : > { %1754 = vst [vmem:[%s2979_s2 + $0x8] sm:$0xff] %v1690_v4  ;;  %v1498_v17 = vadd.f32 %v1434_v59, %v1370_v6  ;;  %v733_v29 = vld [vmem:[%s2898_s13 + $0x30] sm:$0xff]  ;;  %v1436_v34 = vld [vmem:[%s2929_s25 + $0x28] sm:$0xff]  ;;  %v1052_v39 = vadd.f32 %v988_v20, %v924_v26  ;;  %v670_v44 = vld [vmem:[%s2890_s20 + $0x38] sm:$0xff]  ;;  %p2494_p7 = pneg %p2493_p13 }
  0xe9   : > { %v861_v30 = vld [vmem:[%s2905_s27 + $0x30] sm:$0xff]  ;;  %v1499_v33 = vadd.f32 %v1435_v13, %v1371_v19  ;;  %v797_v35 = vadd.f32 %v733_v29, %v669_v28  ;;  %1755 = vst [vmem:[%s2979_s2 + $0x10] sm:$0xff] %v1691_v23  ;;  %v1564_v38 = vmul.f32 %v2952_v25, %v1051_v24  ;;  %v1372_v40 = vadd.f32 %v1308_v22, %v1244_v27  ;;  %v734_v49 = vld [vmem:[%s2898_s13 + $0x38] sm:$0xff]  ;;  %v671_v62 = vld [vmem:[%s2890_s20 + $0x40] sm:$0xff] }
  0xea   : > { %v1628_v31 = vmul.f32 %v2958_v32, %v1498_v17  ;;  %v1117_v36 = vld [vmem:[%s2915_s1 + $0x30] sm:$0xff]  ;;  %v862_v50 = vld [vmem:[%s2905_s27 + $0x38] sm:$0xff]  ;;  %v1565_v52 = vmul.f32 %v2952_v25, %v1052_v39  ;;  %v798_v54 = vadd.f32 %v734_v49, %v670_v44  ;;  %v735_v63 = vld [vmem:[%s2898_s13 + $0x40] sm:$0xff]  ;;  %p2499_p9 = pnand %p2498_p0, %p2494_p7 }
  0xeb   : > { %v1181_v37 = vld [vmem:[%s2918_s23 + $0x30] sm:$0xff]  ;;  %v1629_v46 = vmul.f32 %v2958_v32, %v1499_v33  ;;  %v925_v47 = vadd.f32 %v861_v30, %v797_v35  ;;  %v1500_v51 = vadd.f32 %v1436_v34, %v1372_v40  ;;  %v1118_v55 = vld [vmem:[%s2915_s1 + $0x38] sm:$0xff]  ;;  %v799_v4 = vadd.f32 %v735_v63, %v671_v62  ;;  %v863_v5 = vld [vmem:[%s2905_s27 + $0x40] sm:$0xff] }
  0xec   : > { %v989_v41 = vld [vmem:[%s2908_s3 + $0x30] sm:$0xff]  ;;  %v1245_v42 = vadd.f32 %v1181_v37, %v1117_v36  ;;  %v1692_v45 = vsub.f32 %v1563_v18, %v1628_v31  ;;  %v1182_v56 = vld [vmem:[%s2918_s23 + $0x38] sm:$0xff]  ;;  %v926_v2 = vadd.f32 %v862_v50, %v798_v54  ;;  %v1119_v6 = vld [vmem:[%s2915_s1 + $0x40] sm:$0xff] }
  0xed   : > { %v1309_v43 = vld [vmem:[%s2925_s24 + $0x30] sm:$0xff]  ;;  %v1310_v57 = vld [vmem:[%s2925_s24 + $0x38] sm:$0xff]  ;;  %v1693_v58 = vsub.f32 %v1564_v38, %v1629_v46  ;;  %v1053_v59 = vadd.f32 %v989_v41, %v925_v47  ;;  %v1246_v61 = vadd.f32 %v1182_v56, %v1118_v55  ;;  %v1630_v0 = vmul.f32 %v2958_v32, %v1500_v51  ;;  %v991_v9 = vld [vmem:[%s2908_s3 + $0x40] sm:$0xff] }
  0xee   : > { %v1437_v48 = vld [vmem:[%s2929_s25 + $0x30] sm:$0xff]  ;;  %v1373_v53 = vadd.f32 %v1309_v43, %v1245_v42  ;;  %1756 = vst [vmem:[%s2979_s2 + $0x18] sm:$0xff] %v1692_v45  ;;  %v990_v60 = vld [vmem:[%s2908_s3 + $0x38] sm:$0xff]  ;;  %v1183_v10 = vld [vmem:[%s2918_s23 + $0x40] sm:$0xff]  ;;  %v927_v15 = vadd.f32 %v863_v5, %v799_v4 }
  0xef   : > { %v1438_v3 = vld [vmem:[%s2929_s25 + $0x38] sm:$0xff]  ;;  %1757 = vst [vmem:[%s2979_s2 + $0x20] sm:$0xff] %v1693_v58  ;;  %v1566_v7 = vmul.f32 %v2952_v25, %v1053_v59  ;;  %v1374_v8 = vadd.f32 %v1310_v57, %v1246_v61  ;;  %v1311_v11 = vld [vmem:[%s2925_s24 + $0x40] sm:$0xff]  ;;  %v1694_v12 = vsub.f32 %v1565_v52, %v1630_v0  ;;  %v1054_v14 = vadd.f32 %v990_v60, %v926_v2  ;;  %v672_v16 = vld [vmem:[%s2890_s20 + $0x48] sm:$0xff] }
  0xf0   : > { %v1501_v1 = vadd.f32 %v1437_v48, %v1373_v53  ;;  %v736_v17 = vld [vmem:[%s2898_s13 + $0x48] sm:$0xff]  ;;  %v1247_v20 = vadd.f32 %v1183_v10, %v1119_v6  ;;  %v1439_v21 = vld [vmem:[%s2929_s25 + $0x40] sm:$0xff]  ;;  %v1055_v28 = vadd.f32 %v991_v9, %v927_v15  ;;  %v673_v33 = vld [vmem:[%s2890_s20 + $0x50] sm:$0xff] }
  0xf1   : > { %v864_v18 = vld [vmem:[%s2905_s27 + $0x48] sm:$0xff]  ;;  %v1502_v19 = vadd.f32 %v1438_v3, %v1374_v8  ;;  %v800_v22 = vadd.f32 %v736_v17, %v672_v16  ;;  %1758 = vst [vmem:[%s2979_s2 + $0x28] sm:$0xff] %v1694_v12  ;;  %v1567_v27 = vmul.f32 %v2952_v25, %v1054_v14  ;;  %v737_v38 = vld [vmem:[%s2898_s13 + $0x50] sm:$0xff]  ;;  %v674_v51 = vld [vmem:[%s2890_s20 + $0x58] sm:$0xff] }
  0xf2   : > { %v1631_v13 = vmul.f32 %v2958_v32, %v1501_v1  ;;  %v1120_v23 = vld [vmem:[%s2915_s1 + $0x48] sm:$0xff]  ;;  %v1375_v35 = vadd.f32 %v1311_v11, %v1247_v20  ;;  %v865_v39 = vld [vmem:[%s2905_s27 + $0x50] sm:$0xff]  ;;  %v1568_v40 = vmul.f32 %v2952_v25, %v1055_v28  ;;  %v801_v42 = vadd.f32 %v737_v38, %v673_v33  ;;  %v738_v52 = vld [vmem:[%s2898_s13 + $0x58] sm:$0xff] }
  0xf3   : > { %v1184_v24 = vld [vmem:[%s2918_s23 + $0x48] sm:$0xff]  ;;  %v1632_v34 = vmul.f32 %v2958_v32, %v1502_v19  ;;  %v928_v36 = vadd.f32 %v864_v18, %v800_v22  ;;  %v1121_v43 = vld [vmem:[%s2915_s1 + $0x50] sm:$0xff]  ;;  %v802_v56 = vadd.f32 %v738_v52, %v674_v51  ;;  %v866_v57 = vld [vmem:[%s2905_s27 + $0x58] sm:$0xff] }
  0xf4   : > { %v1695_v26 = vsub.f32 %v1566_v7, %v1631_v13  ;;  %v992_v29 = vld [vmem:[%s2908_s3 + $0x48] sm:$0xff]  ;;  %v1248_v30 = vadd.f32 %v1184_v24, %v1120_v23  ;;  %v1185_v44 = vld [vmem:[%s2918_s23 + $0x50] sm:$0xff]  ;;  %v1503_v47 = vadd.f32 %v1439_v21, %v1375_v35  ;;  %v929_v54 = vadd.f32 %v865_v39, %v801_v42  ;;  %v1122_v58 = vld [vmem:[%s2915_s1 + $0x58] sm:$0xff] }
  0xf5   : > { %v1312_v31 = vld [vmem:[%s2925_s24 + $0x48] sm:$0xff]  ;;  %v1313_v45 = vld [vmem:[%s2925_s24 + $0x50] sm:$0xff]  ;;  %v1696_v46 = vsub.f32 %v1567_v27, %v1632_v34  ;;  %v1056_v48 = vadd.f32 %v992_v29, %v928_v36  ;;  %v1249_v50 = vadd.f32 %v1185_v44, %v1121_v43  ;;  %v994_v62 = vld [vmem:[%s2908_s3 + $0x58] sm:$0xff]  ;;  %v930_v3 = vadd.f32 %v866_v57, %v802_v56 }
  0xf6   : > { %v1440_v37 = vld [vmem:[%s2929_s25 + $0x48] sm:$0xff]  ;;  %1759 = vst [vmem:[%s2979_s2 + $0x30] sm:$0xff] %v1695_v26  ;;  %v1376_v41 = vadd.f32 %v1312_v31, %v1248_v30  ;;  %v993_v49 = vld [vmem:[%s2908_s3 + $0x50] sm:$0xff]  ;;  %v1633_v59 = vmul.f32 %v2958_v32, %v1503_v47  ;;  %v1186_v63 = vld [vmem:[%s2918_s23 + $0x58] sm:$0xff] }
  0xf7   : > { %v1441_v55 = vld [vmem:[%s2929_s25 + $0x50] sm:$0xff]  ;;  %1760 = vst [vmem:[%s2979_s2 + $0x38] sm:$0xff] %v1696_v46  ;;  %v1569_v60 = vmul.f32 %v2952_v25, %v1056_v48  ;;  %v1377_v61 = vadd.f32 %v1313_v45, %v1249_v50  ;;  %v1314_v0 = vld [vmem:[%s2925_s24 + $0x58] sm:$0xff]  ;;  %v1057_v2 = vadd.f32 %v993_v49, %v929_v54  ;;  %v1250_v4 = vadd.f32 %v1186_v63, %v1122_v58  ;;  %v675_v5 = vld [vmem:[%s2890_s20 + $0x60] sm:$0xff] }
  0xf8   : > { %v1504_v53 = vadd.f32 %v1440_v37, %v1376_v41  ;;  %v739_v6 = vld [vmem:[%s2898_s13 + $0x60] sm:$0xff]  ;;  %v1697_v8 = vsub.f32 %v1568_v40, %v1633_v59  ;;  %v1442_v10 = vld [vmem:[%s2929_s25 + $0x58] sm:$0xff]  ;;  %v1058_v16 = vadd.f32 %v994_v62, %v930_v3  ;;  %v676_v20 = vld [vmem:[%s2890_s20 + $0x68] sm:$0xff] }
  0xf9   : > { %v867_v7 = vld [vmem:[%s2905_s27 + $0x60] sm:$0xff]  ;;  %v1505_v9 = vadd.f32 %v1441_v55, %v1377_v61  ;;  %v803_v11 = vadd.f32 %v739_v6, %v675_v5  ;;  %v1570_v15 = vmul.f32 %v2952_v25, %v1057_v2  ;;  %v1378_v17 = vadd.f32 %v1314_v0, %v1250_v4  ;;  %v740_v26 = vld [vmem:[%s2898_s13 + $0x68] sm:$0xff]  ;;  %v677_v40 = vld [vmem:[%s2890_s20 + $0x70] sm:$0xff] }
  0xfa   : > { %v1634_v1 = vmul.f32 %v2958_v32, %v1504_v53  ;;  %v1123_v12 = vld [vmem:[%s2915_s1 + $0x60] sm:$0xff]  ;;  %1761 = vst [vmem:[%s2979_s2 + $0x40] sm:$0xff] %v1697_v8  ;;  %v868_v27 = vld [vmem:[%s2905_s27 + $0x68] sm:$0xff]  ;;  %v1571_v29 = vmul.f32 %v2952_v25, %v1058_v16  ;;  %v804_v30 = vadd.f32 %v740_v26, %v676_v20  ;;  %v741_v41 = vld [vmem:[%s2898_s13 + $0x70] sm:$0xff] }
  0xfb   : > { %v1187_v13 = vld [vmem:[%s2918_s23 + $0x60] sm:$0xff]  ;;  %v1635_v21 = vmul.f32 %v2958_v32, %v1505_v9  ;;  %v931_v22 = vadd.f32 %v867_v7, %v803_v11  ;;  %v1506_v28 = vadd.f32 %v1442_v10, %v1378_v17  ;;  %v1124_v31 = vld [vmem:[%s2915_s1 + $0x68] sm:$0xff]  ;;  %v805_v45 = vadd.f32 %v741_v41, %v677_v40  ;;  %v869_v46 = vld [vmem:[%s2905_s27 + $0x70] sm:$0xff] }
  0xfc   : > { %v1698_v14 = vsub.f32 %v1569_v60, %v1634_v1  ;;  %v995_v18 = vld [vmem:[%s2908_s3 + $0x60] sm:$0xff]  ;;  %v1251_v23 = vadd.f32 %v1187_v13, %v1123_v12  ;;  %v1188_v33 = vld [vmem:[%s2918_s23 + $0x68] sm:$0xff]  ;;  %v932_v43 = vadd.f32 %v868_v27, %v804_v30  ;;  %v1125_v47 = vld [vmem:[%s2915_s1 + $0x70] sm:$0xff] }
  0xfd   : > { %v1315_v19 = vld [vmem:[%s2925_s24 + $0x60] sm:$0xff]  ;;  %v1316_v34 = vld [vmem:[%s2925_s24 + $0x68] sm:$0xff]  ;;  %v1699_v35 = vsub.f32 %v1570_v15, %v1635_v21  ;;  %v1059_v36 = vadd.f32 %v995_v18, %v931_v22  ;;  %v1252_v39 = vadd.f32 %v1188_v33, %v1124_v31  ;;  %v1636_v42 = vmul.f32 %v2958_v32, %v1506_v28  ;;  %v997_v51 = vld [vmem:[%s2908_s3 + $0x70] sm:$0xff] }
  0xfe   : > { %v1443_v24 = vld [vmem:[%s2929_s25 + $0x60] sm:$0xff]  ;;  %1762 = vst [vmem:[%s2979_s2 + $0x48] sm:$0xff] %v1698_v14  ;;  %v1379_v37 = vadd.f32 %v1315_v19, %v1251_v23  ;;  %v996_v38 = vld [vmem:[%s2908_s3 + $0x68] sm:$0xff]  ;;  %v1189_v52 = vld [vmem:[%s2918_s23 + $0x70] sm:$0xff]  ;;  %v933_v56 = vadd.f32 %v869_v46, %v805_v45 }
  0xff   : > { %v1444_v44 = vld [vmem:[%s2929_s25 + $0x68] sm:$0xff]  ;;  %1763 = vst [vmem:[%s2979_s2 + $0x50] sm:$0xff] %v1699_v35  ;;  %v1572_v49 = vmul.f32 %v2952_v25, %v1059_v36  ;;  %v1380_v50 = vadd.f32 %v1316_v34, %v1252_v39  ;;  %v1317_v53 = vld [vmem:[%s2925_s24 + $0x70] sm:$0xff]  ;;  %v1700_v54 = vsub.f32 %v1571_v29, %v1636_v42  ;;  %v1060_v55 = vadd.f32 %v996_v38, %v932_v43  ;;  %v678_v58 = vld [vmem:[%s2890_s20 + $0x78] sm:$0xff] }
 0x100   : > { %v1507_v48 = vadd.f32 %v1443_v24, %v1379_v37  ;;  %v1253_v57 = vadd.f32 %v1189_v52, %v1125_v47  ;;  %v742_v59 = vld [vmem:[%s2898_s13 + $0x78] sm:$0xff]  ;;  %v1445_v63 = vld [vmem:[%s2929_s25 + $0x70] sm:$0xff]  ;;  %v1061_v4 = vadd.f32 %v997_v51, %v933_v56  ;;  %v679_v9 = vld [vmem:[%s2890_s20 + $0x80] sm:$0xff] }
 0x101   : > { %v870_v60 = vld [vmem:[%s2905_s27 + $0x78] sm:$0xff]  ;;  %v1508_v62 = vadd.f32 %v1444_v44, %v1380_v50  ;;  %v806_v0 = vadd.f32 %v742_v59, %v678_v58  ;;  %1764 = vst [vmem:[%s2979_s2 + $0x58] sm:$0xff] %v1700_v54  ;;  %v1573_v3 = vmul.f32 %v2952_v25, %v1060_v55  ;;  %v743_v14 = vld [vmem:[%s2898_s13 + $0x80] sm:$0xff]  ;;  %v680_v28 = vld [vmem:[%s2890_s20 + $0x88] sm:$0xff] }
 0x102   : > { %v1637_v61 = vmul.f32 %v2958_v32, %v1507_v48  ;;  %v1126_v1 = vld [vmem:[%s2915_s1 + $0x78] sm:$0xff]  ;;  %v1381_v5 = vadd.f32 %v1317_v53, %v1253_v57  ;;  %v871_v15 = vld [vmem:[%s2905_s27 + $0x80] sm:$0xff]  ;;  %v1574_v17 = vmul.f32 %v2952_v25, %v1061_v4  ;;  %v807_v19 = vadd.f32 %v743_v14, %v679_v9  ;;  %v744_v29 = vld [vmem:[%s2898_s13 + $0x88] sm:$0xff] }
 0x103   : > { %v1190_v2 = vld [vmem:[%s2918_s23 + $0x78] sm:$0xff]  ;;  %v1638_v11 = vmul.f32 %v2958_v32, %v1508_v62  ;;  %v934_v12 = vadd.f32 %v870_v60, %v806_v0  ;;  %v1127_v20 = vld [vmem:[%s2915_s1 + $0x80] sm:$0xff]  ;;  %v808_v35 = vadd.f32 %v744_v29, %v680_v28  ;;  %v872_v36 = vld [vmem:[%s2905_s27 + $0x88] sm:$0xff] }
 0x104   : > { %v998_v6 = vld [vmem:[%s2908_s3 + $0x78] sm:$0xff]  ;;  %v1254_v7 = vadd.f32 %v1190_v2, %v1126_v1  ;;  %v1701_v10 = vsub.f32 %v1572_v49, %v1637_v61  ;;  %v1509_v16 = vadd.f32 %v1445_v63, %v1381_v5  ;;  %v1191_v21 = vld [vmem:[%s2918_s23 + $0x80] sm:$0xff]  ;;  %v935_v33 = vadd.f32 %v871_v15, %v807_v19  ;;  %v1128_v37 = vld [vmem:[%s2915_s1 + $0x88] sm:$0xff] }
 0x105   : > { %v1318_v8 = vld [vmem:[%s2925_s24 + $0x78] sm:$0xff]  ;;  %v1319_v22 = vld [vmem:[%s2925_s24 + $0x80] sm:$0xff]  ;;  %v1702_v23 = vsub.f32 %v1573_v3, %v1638_v11  ;;  %v1062_v24 = vadd.f32 %v998_v6, %v934_v12  ;;  %v1255_v27 = vadd.f32 %v1191_v21, %v1127_v20  ;;  %v1000_v40 = vld [vmem:[%s2908_s3 + $0x88] sm:$0xff]  ;;  %v936_v46 = vadd.f32 %v872_v36, %v808_v35 }
 0x106   : > { %v1446_v13 = vld [vmem:[%s2929_s25 + $0x78] sm:$0xff]  ;;  %v1382_v18 = vadd.f32 %v1318_v8, %v1254_v7  ;;  %1765 = vst [vmem:[%s2979_s2 + $0x60] sm:$0xff] %v1701_v10  ;;  %v999_v26 = vld [vmem:[%s2908_s3 + $0x80] sm:$0xff]  ;;  %v1639_v30 = vmul.f32 %v2958_v32, %v1509_v16  ;;  %v1192_v41 = vld [vmem:[%s2918_s23 + $0x88] sm:$0xff] }
 0x107   : > { %v1447_v34 = vld [vmem:[%s2929_s25 + $0x80] sm:$0xff]  ;;  %1766 = vst [vmem:[%s2979_s2 + $0x68] sm:$0xff] %v1702_v23  ;;  %v1575_v38 = vmul.f32 %v2952_v25, %v1062_v24  ;;  %v1383_v39 = vadd.f32 %v1319_v22, %v1255_v27  ;;  %v1320_v42 = vld [vmem:[%s2925_s24 + $0x88] sm:$0xff]  ;;  %v1063_v45 = vadd.f32 %v999_v26, %v935_v33  ;;  %v681_v47 = vld [vmem:[%s2890_s20 + $0x90] sm:$0xff]  ;;  %v1256_v51 = vadd.f32 %v1192_v41, %v1128_v37 }
 0x108   : > { %v1510_v31 = vadd.f32 %v1446_v13, %v1382_v18  ;;  %v1703_v43 = vsub.f32 %v1574_v17, %v1639_v30  ;;  %v745_v48 = vld [vmem:[%s2898_s13 + $0x90] sm:$0xff]  ;;  %v1448_v52 = vld [vmem:[%s2929_s25 + $0x88] sm:$0xff]  ;;  %v1064_v58 = vadd.f32 %v1000_v40, %v936_v46  ;;  %v682_v62 = vld [vmem:[%s2890_s20 + $0x98] sm:$0xff] }
 0x109   : > { %v873_v49 = vld [vmem:[%s2905_s27 + $0x90] sm:$0xff]  ;;  %v1511_v50 = vadd.f32 %v1447_v34, %v1383_v39  ;;  %v809_v53 = vadd.f32 %v745_v48, %v681_v47  ;;  %v1576_v57 = vmul.f32 %v2952_v25, %v1063_v45  ;;  %v1384_v0 = vadd.f32 %v1320_v42, %v1256_v51  ;;  %v746_v3 = vld [vmem:[%s2898_s13 + $0x98] sm:$0xff]  ;;  %v683_v16 = vld [vmem:[%s2890_s20 + $0xa0] sm:$0xff] }
 0x10a   : > { %v1640_v44 = vmul.f32 %v2958_v32, %v1510_v31  ;;  %v1129_v54 = vld [vmem:[%s2915_s1 + $0x90] sm:$0xff]  ;;  %1767 = vst [vmem:[%s2979_s2 + $0x70] sm:$0xff] %v1703_v43  ;;  %v874_v4 = vld [vmem:[%s2905_s27 + $0x98] sm:$0xff]  ;;  %v1577_v5 = vmul.f32 %v2952_v25, %v1064_v58  ;;  %v810_v7 = vadd.f32 %v746_v3, %v682_v62  ;;  %v747_v17 = vld [vmem:[%s2898_s13 + $0xa0] sm:$0xff] }
 0x10b   : > { %v1193_v55 = vld [vmem:[%s2918_s23 + $0x90] sm:$0xff]  ;;  %v1641_v63 = vmul.f32 %v2958_v32, %v1511_v50  ;;  %v937_v1 = vadd.f32 %v873_v49, %v809_v53  ;;  %v1130_v8 = vld [vmem:[%s2915_s1 + $0x98] sm:$0xff]  ;;  %v1512_v12 = vadd.f32 %v1448_v52, %v1384_v0  ;;  %v811_v21 = vadd.f32 %v747_v17, %v683_v16  ;;  %v875_v22 = vld [vmem:[%s2905_s27 + $0xa0] sm:$0xff] }
 0x10c   : > { %v1704_v56 = vsub.f32 %v1575_v38, %v1640_v44  ;;  %v1001_v59 = vld [vmem:[%s2908_s3 + $0x90] sm:$0xff]  ;;  %v1257_v60 = vadd.f32 %v1193_v55, %v1129_v54  ;;  %v1194_v9 = vld [vmem:[%s2918_s23 + $0x98] sm:$0xff]  ;;  %v938_v19 = vadd.f32 %v874_v4, %v810_v7  ;;  %v1131_v23 = vld [vmem:[%s2915_s1 + $0xa0] sm:$0xff] }
 0x10d   : > { %v1321_v61 = vld [vmem:[%s2925_s24 + $0x90] sm:$0xff]  ;;  %v1322_v10 = vld [vmem:[%s2925_s24 + $0x98] sm:$0xff]  ;;  %v1705_v11 = vsub.f32 %v1576_v57, %v1641_v63  ;;  %v1065_v13 = vadd.f32 %v1001_v59, %v937_v1  ;;  %v1258_v15 = vadd.f32 %v1194_v9, %v1130_v8  ;;  %v1642_v24 = vmul.f32 %v2958_v32, %v1512_v12  ;;  %v1003_v28 = vld [vmem:[%s2908_s3 + $0xa0] sm:$0xff] }
 0x10e   : > { %v1449_v2 = vld [vmem:[%s2929_s25 + $0x90] sm:$0xff]  ;;  %1768 = vst [vmem:[%s2979_s2 + $0x78] sm:$0xff] %v1704_v56  ;;  %v1385_v6 = vadd.f32 %v1321_v61, %v1257_v60  ;;  %v1002_v14 = vld [vmem:[%s2908_s3 + $0x98] sm:$0xff]  ;;  %v1195_v29 = vld [vmem:[%s2918_s23 + $0xa0] sm:$0xff]  ;;  %v939_v34 = vadd.f32 %v875_v22, %v811_v21 }
 0x10f   : > { %v1450_v20 = vld [vmem:[%s2929_s25 + $0x98] sm:$0xff]  ;;  %1769 = vst [vmem:[%s2979_s2 + $0x80] sm:$0xff] %v1705_v11  ;;  %v1578_v26 = vmul.f32 %v2952_v25, %v1065_v13  ;;  %v1386_v27 = vadd.f32 %v1322_v10, %v1258_v15  ;;  %v1323_v30 = vld [vmem:[%s2925_s24 + $0xa0] sm:$0xff]  ;;  %v1066_v33 = vadd.f32 %v1002_v14, %v938_v19  ;;  %v1259_v35 = vadd.f32 %v1195_v29, %v1131_v23  ;;  %v684_v36 = vld [vmem:[%s2890_s20 + $0xa8] sm:$0xff] }
 0x110   : > { %v1513_v18 = vadd.f32 %v1449_v2, %v1385_v6  ;;  %v748_v37 = vld [vmem:[%s2898_s13 + $0xa8] sm:$0xff]  ;;  %v1706_v39 = vsub.f32 %v1577_v5, %v1642_v24  ;;  %v1451_v41 = vld [vmem:[%s2929_s25 + $0xa0] sm:$0xff]  ;;  %v1067_v47 = vadd.f32 %v1003_v28, %v939_v34  ;;  %v685_v51 = vld [vmem:[%s2890_s20 + $0xb0] sm:$0xff] }
 0x111   : > { %v876_v38 = vld [vmem:[%s2905_s27 + $0xa8] sm:$0xff]  ;;  %v1514_v40 = vadd.f32 %v1450_v20, %v1386_v27  ;;  %v812_v42 = vadd.f32 %v748_v37, %v684_v36  ;;  %v1579_v46 = vmul.f32 %v2952_v25, %v1066_v33  ;;  %v1387_v48 = vadd.f32 %v1323_v30, %v1259_v35  ;;  %v749_v56 = vld [vmem:[%s2898_s13 + $0xb0] sm:$0xff]  ;;  %v686_v5 = vld [vmem:[%s2890_s20 + $0xb8] sm:$0xff] }
 0x112   : > { %v1643_v31 = vmul.f32 %v2958_v32, %v1513_v18  ;;  %v1132_v43 = vld [vmem:[%s2915_s1 + $0xa8] sm:$0xff]  ;;  %1770 = vst [vmem:[%s2979_s2 + $0x88] sm:$0xff] %v1706_v39  ;;  %v877_v57 = vld [vmem:[%s2905_s27 + $0xb0] sm:$0xff]  ;;  %v1580_v59 = vmul.f32 %v2952_v25, %v1067_v47  ;;  %v813_v60 = vadd.f32 %v749_v56, %v685_v51  ;;  %v750_v6 = vld [vmem:[%s2898_s13 + $0xb8] sm:$0xff] }
 0x113   : > { %v1196_v44 = vld [vmem:[%s2918_s23 + $0xa8] sm:$0xff]  ;;  %v1644_v52 = vmul.f32 %v2958_v32, %v1514_v40  ;;  %v940_v53 = vadd.f32 %v876_v38, %v812_v42  ;;  %v1515_v58 = vadd.f32 %v1451_v41, %v1387_v48  ;;  %v1133_v61 = vld [vmem:[%s2915_s1 + $0xb0] sm:$0xff]  ;;  %v814_v10 = vadd.f32 %v750_v6, %v686_v5  ;;  %v878_v11 = vld [vmem:[%s2905_s27 + $0xb8] sm:$0xff] }
 0x114   : > { %v1707_v45 = vsub.f32 %v1578_v26, %v1643_v31  ;;  %v1004_v49 = vld [vmem:[%s2908_s3 + $0xa8] sm:$0xff]  ;;  %v1260_v54 = vadd.f32 %v1196_v44, %v1132_v43  ;;  %v1197_v62 = vld [vmem:[%s2918_s23 + $0xb0] sm:$0xff]  ;;  %v941_v8 = vadd.f32 %v877_v57, %v813_v60  ;;  %v1134_v12 = vld [vmem:[%s2915_s1 + $0xb8] sm:$0xff] }
 0x115   : > { %v1324_v50 = vld [vmem:[%s2925_s24 + $0xa8] sm:$0xff]  ;;  %v1325_v63 = vld [vmem:[%s2925_s24 + $0xb0] sm:$0xff]  ;;  %v1708_v0 = vsub.f32 %v1579_v46, %v1644_v52  ;;  %v1068_v1 = vadd.f32 %v1004_v49, %v940_v53  ;;  %v1261_v4 = vadd.f32 %v1197_v62, %v1133_v61  ;;  %v1645_v7 = vmul.f32 %v2958_v32, %v1515_v58  ;;  %v1006_v16 = vld [vmem:[%s2908_s3 + $0xb8] sm:$0xff] }
 0x116   : > { %v1452_v55 = vld [vmem:[%s2929_s25 + $0xa8] sm:$0xff]  ;;  %1771 = vst [vmem:[%s2979_s2 + $0x90] sm:$0xff] %v1707_v45  ;;  %v1388_v2 = vadd.f32 %v1324_v50, %v1260_v54  ;;  %v1005_v3 = vld [vmem:[%s2908_s3 + $0xb0] sm:$0xff]  ;;  %v1198_v17 = vld [vmem:[%s2918_s23 + $0xb8] sm:$0xff]  ;;  %v942_v21 = vadd.f32 %v878_v11, %v814_v10 }
 0x117   : > { %v1453_v9 = vld [vmem:[%s2929_s25 + $0xb0] sm:$0xff]  ;;  %1772 = vst [vmem:[%s2979_s2 + $0x98] sm:$0xff] %v1708_v0  ;;  %v1581_v14 = vmul.f32 %v2952_v25, %v1068_v1  ;;  %v1389_v15 = vadd.f32 %v1325_v63, %v1261_v4  ;;  %v1326_v18 = vld [vmem:[%s2925_s24 + $0xb8] sm:$0xff]  ;;  %v1709_v19 = vsub.f32 %v1580_v59, %v1645_v7  ;;  %v1069_v20 = vadd.f32 %v1005_v3, %v941_v8  ;;  %v687_v23 = vld [vmem:[%s2890_s20 + $0xc0] sm:$0xff] }
 0x118   : > { %v1516_v13 = vadd.f32 %v1452_v55, %v1388_v2  ;;  %v1262_v22 = vadd.f32 %v1198_v17, %v1134_v12  ;;  %v751_v24 = vld [vmem:[%s2898_s13 + $0xc0] sm:$0xff]  ;;  %v1454_v29 = vld [vmem:[%s2929_s25 + $0xb8] sm:$0xff]  ;;  %v1070_v35 = vadd.f32 %v1006_v16, %v942_v21  ;;  %v688_v40 = vld [vmem:[%s2890_s20 + $0xc8] sm:$0xff] }
 0x119   : > { %v879_v26 = vld [vmem:[%s2905_s27 + $0xc0] sm:$0xff]  ;;  %v1517_v28 = vadd.f32 %v1453_v9, %v1389_v15  ;;  %v815_v30 = vadd.f32 %v751_v24, %v687_v23  ;;  %1773 = vst [vmem:[%s2979_s2 + $0xa0] sm:$0xff] %v1709_v19  ;;  %v1582_v34 = vmul.f32 %v2952_v25, %v1069_v20  ;;  %v752_v45 = vld [vmem:[%s2898_s13 + $0xc8] sm:$0xff]  ;;  %v689_v58 = vld [vmem:[%s2890_s20 + $0xd0] sm:$0xff] }
 0x11a   : > { %v1646_v27 = vmul.f32 %v2958_v32, %v1516_v13  ;;  %v1135_v31 = vld [vmem:[%s2915_s1 + $0xc0] sm:$0xff]  ;;  %v1390_v36 = vadd.f32 %v1326_v18, %v1262_v22  ;;  %v880_v46 = vld [vmem:[%s2905_s27 + $0xc8] sm:$0xff]  ;;  %v1583_v48 = vmul.f32 %v2952_v25, %v1070_v35  ;;  %v816_v50 = vadd.f32 %v752_v45, %v688_v40  ;;  %v753_v59 = vld [vmem:[%s2898_s13 + $0xd0] sm:$0xff] }
 0x11b   : > { %v1199_v33 = vld [vmem:[%s2918_s23 + $0xc0] sm:$0xff]  ;;  %v1647_v42 = vmul.f32 %v2958_v32, %v1517_v28  ;;  %v943_v43 = vadd.f32 %v879_v26, %v815_v30  ;;  %v1136_v51 = vld [vmem:[%s2915_s1 + $0xc8] sm:$0xff]  ;;  %v817_v0 = vadd.f32 %v753_v59, %v689_v58  ;;  %v881_v1 = vld [vmem:[%s2905_s27 + $0xd0] sm:$0xff] }
 0x11c   : > { %v1007_v37 = vld [vmem:[%s2908_s3 + $0xc0] sm:$0xff]  ;;  %v1263_v38 = vadd.f32 %v1199_v33, %v1135_v31  ;;  %v1710_v41 = vsub.f32 %v1581_v14, %v1646_v27  ;;  %v1518_v47 = vadd.f32 %v1454_v29, %v1390_v36  ;;  %v1200_v52 = vld [vmem:[%s2918_s23 + $0xc8] sm:$0xff]  ;;  %v944_v62 = vadd.f32 %v880_v46, %v816_v50  ;;  %v1137_v2 = vld [vmem:[%s2915_s1 + $0xd0] sm:$0xff] }
 0x11d   : > { %v1327_v39 = vld [vmem:[%s2925_s24 + $0xc0] sm:$0xff]  ;;  %v1328_v53 = vld [vmem:[%s2925_s24 + $0xc8] sm:$0xff]  ;;  %v1711_v54 = vsub.f32 %v1582_v34, %v1647_v42  ;;  %v1071_v55 = vadd.f32 %v1007_v37, %v943_v43  ;;  %v1264_v57 = vadd.f32 %v1200_v52, %v1136_v51  ;;  %v1009_v5 = vld [vmem:[%s2908_s3 + $0xd0] sm:$0xff]  ;;  %v945_v11 = vadd.f32 %v881_v1, %v817_v0 }
 0x11e   : > { %v1455_v44 = vld [vmem:[%s2929_s25 + $0xc0] sm:$0xff]  ;;  %v1391_v49 = vadd.f32 %v1327_v39, %v1263_v38  ;;  %1774 = vst [vmem:[%s2979_s2 + $0xa8] sm:$0xff] %v1710_v41  ;;  %v1008_v56 = vld [vmem:[%s2908_s3 + $0xc8] sm:$0xff]  ;;  %v1648_v60 = vmul.f32 %v2958_v32, %v1518_v47  ;;  %v1201_v6 = vld [vmem:[%s2918_s23 + $0xd0] sm:$0xff] }
 0x11f   : > { %v1456_v63 = vld [vmem:[%s2929_s25 + $0xc8] sm:$0xff]  ;;  %1775 = vst [vmem:[%s2979_s2 + $0xb0] sm:$0xff] %v1711_v54  ;;  %v1584_v3 = vmul.f32 %v2952_v25, %v1071_v55  ;;  %v1392_v4 = vadd.f32 %v1328_v53, %v1264_v57  ;;  %v1329_v7 = vld [vmem:[%s2925_s24 + $0xd0] sm:$0xff]  ;;  %v1072_v10 = vadd.f32 %v1008_v56, %v944_v62  ;;  %v690_v12 = vld [vmem:[%s2890_s20 + $0xd8] sm:$0xff]  ;;  %v1265_v16 = vadd.f32 %v1201_v6, %v1137_v2 }
 0x120   : > { %v1519_v61 = vadd.f32 %v1455_v44, %v1391_v49  ;;  %v1712_v8 = vsub.f32 %v1583_v48, %v1648_v60  ;;  %v754_v13 = vld [vmem:[%s2898_s13 + $0xd8] sm:$0xff]  ;;  %v1457_v17 = vld [vmem:[%s2929_s25 + $0xd0] sm:$0xff]  ;;  %v1073_v23 = vadd.f32 %v1009_v5, %v945_v11  ;;  %v691_v28 = vld [vmem:[%s2890_s20 + $0xe0] sm:$0xff] }
 0x121   : > { %v882_v14 = vld [vmem:[%s2905_s27 + $0xd8] sm:$0xff]  ;;  %v1520_v15 = vadd.f32 %v1456_v63, %v1392_v4  ;;  %v818_v18 = vadd.f32 %v754_v13, %v690_v12  ;;  %v1585_v22 = vmul.f32 %v2952_v25, %v1072_v10  ;;  %v1393_v30 = vadd.f32 %v1329_v7, %v1265_v16  ;;  %v755_v34 = vld [vmem:[%s2898_s13 + $0xe0] sm:$0xff]  ;;  %v692_v47 = vld [vmem:[%s2890_s20 + $0xe8] sm:$0xff] }
 0x122   : > { %v1649_v9 = vmul.f32 %v2958_v32, %v1519_v61  ;;  %v1138_v19 = vld [vmem:[%s2915_s1 + $0xd8] sm:$0xff]  ;;  %1776 = vst [vmem:[%s2979_s2 + $0xb8] sm:$0xff] %v1712_v8  ;;  %v883_v35 = vld [vmem:[%s2905_s27 + $0xe0] sm:$0xff]  ;;  %v1586_v36 = vmul.f32 %v2952_v25, %v1073_v23  ;;  %v819_v38 = vadd.f32 %v755_v34, %v691_v28  ;;  %v756_v48 = vld [vmem:[%s2898_s13 + $0xe8] sm:$0xff] }
 0x123   : > { %v1202_v20 = vld [vmem:[%s2918_s23 + $0xd8] sm:$0xff]  ;;  %v1650_v29 = vmul.f32 %v2958_v32, %v1520_v15  ;;  %v946_v31 = vadd.f32 %v882_v14, %v818_v18  ;;  %v1139_v39 = vld [vmem:[%s2915_s1 + $0xe0] sm:$0xff]  ;;  %v1521_v43 = vadd.f32 %v1457_v17, %v1393_v30  ;;  %v820_v52 = vadd.f32 %v756_v48, %v692_v47  ;;  %v884_v53 = vld [vmem:[%s2905_s27 + $0xe8] sm:$0xff] }
 0x124   : > { %v1713_v21 = vsub.f32 %v1584_v3, %v1649_v9  ;;  %v1010_v24 = vld [vmem:[%s2908_s3 + $0xd8] sm:$0xff]  ;;  %v1266_v26 = vadd.f32 %v1202_v20, %v1138_v19  ;;  %v1203_v40 = vld [vmem:[%s2918_s23 + $0xe0] sm:$0xff]  ;;  %v947_v50 = vadd.f32 %v883_v35, %v819_v38  ;;  %v1140_v54 = vld [vmem:[%s2915_s1 + $0xe8] sm:$0xff] }
 0x125   : > { %v1330_v27 = vld [vmem:[%s2925_s24 + $0xd8] sm:$0xff]  ;;  %v1331_v41 = vld [vmem:[%s2925_s24 + $0xe0] sm:$0xff]  ;;  %v1714_v42 = vsub.f32 %v1585_v22, %v1650_v29  ;;  %v1074_v44 = vadd.f32 %v1010_v24, %v946_v31  ;;  %v1267_v46 = vadd.f32 %v1203_v40, %v1139_v39  ;;  %v1651_v55 = vmul.f32 %v2958_v32, %v1521_v43  ;;  %v1012_v58 = vld [vmem:[%s2908_s3 + $0xe8] sm:$0xff] }
 0x126   : > { %v1458_v33 = vld [vmem:[%s2929_s25 + $0xd8] sm:$0xff]  ;;  %1777 = vst [vmem:[%s2979_s2 + $0xc0] sm:$0xff] %v1713_v21  ;;  %v1394_v37 = vadd.f32 %v1330_v27, %v1266_v26  ;;  %v1011_v45 = vld [vmem:[%s2908_s3 + $0xe0] sm:$0xff]  ;;  %v1204_v59 = vld [vmem:[%s2918_s23 + $0xe8] sm:$0xff]  ;;  %v948_v63 = vadd.f32 %v884_v53, %v820_v52 }
 0x127   : > { %v1459_v51 = vld [vmem:[%s2929_s25 + $0xe0] sm:$0xff]  ;;  %1778 = vst [vmem:[%s2979_s2 + $0xc8] sm:$0xff] %v1714_v42  ;;  %v1587_v56 = vmul.f32 %v2952_v25, %v1074_v44  ;;  %v1395_v57 = vadd.f32 %v1331_v41, %v1267_v46  ;;  %v1332_v60 = vld [vmem:[%s2925_s24 + $0xe8] sm:$0xff]  ;;  %v1075_v62 = vadd.f32 %v1011_v45, %v947_v50  ;;  %v1268_v0 = vadd.f32 %v1204_v59, %v1140_v54  ;;  %v693_v1 = vld [vmem:[%s2890_s20 + $0xf0] sm:$0xff] }
 0x128   : > { %v1522_v49 = vadd.f32 %v1458_v33, %v1394_v37  ;;  %v757_v2 = vld [vmem:[%s2898_s13 + $0xf0] sm:$0xff]  ;;  %v1715_v4 = vsub.f32 %v1586_v36, %v1651_v55  ;;  %v1460_v6 = vld [vmem:[%s2929_s25 + $0xe8] sm:$0xff]  ;;  %v1076_v12 = vadd.f32 %v1012_v58, %v948_v63  ;;  %v694_v16 = vld [vmem:[%s2890_s20 + $0xf8] sm:$0xff] }
 0x129   : > { %v885_v3 = vld [vmem:[%s2905_s27 + $0xf0] sm:$0xff]  ;;  %v1523_v5 = vadd.f32 %v1459_v51, %v1395_v57  ;;  %v821_v7 = vadd.f32 %v757_v2, %v693_v1  ;;  %v1588_v11 = vmul.f32 %v2952_v25, %v1075_v62  ;;  %v1396_v13 = vadd.f32 %v1332_v60, %v1268_v0  ;;  %v758_v21 = vld [vmem:[%s2898_s13 + $0xf8] sm:$0xff]  ;;  %v695_v36 = vld [vmem:[%s2890_s20 + $0x100] sm:$0xff] }
 0x12a   : > { %v1652_v61 = vmul.f32 %v2958_v32, %v1522_v49  ;;  %v1141_v8 = vld [vmem:[%s2915_s1 + $0xf0] sm:$0xff]  ;;  %1779 = vst [vmem:[%s2979_s2 + $0xd0] sm:$0xff] %v1715_v4  ;;  %v886_v22 = vld [vmem:[%s2905_s27 + $0xf8] sm:$0xff]  ;;  %v1589_v24 = vmul.f32 %v2952_v25, %v1076_v12  ;;  %v822_v26 = vadd.f32 %v758_v21, %v694_v16  ;;  %v759_v37 = vld [vmem:[%s2898_s13 + $0x100] sm:$0xff] }
 0x12b   : > { %v1205_v9 = vld [vmem:[%s2918_s23 + $0xf0] sm:$0xff]  ;;  %v1653_v17 = vmul.f32 %v2958_v32, %v1523_v5  ;;  %v949_v18 = vadd.f32 %v885_v3, %v821_v7  ;;  %v1524_v23 = vadd.f32 %v1460_v6, %v1396_v13  ;;  %v1142_v27 = vld [vmem:[%s2915_s1 + $0xf8] sm:$0xff]  ;;  %v823_v41 = vadd.f32 %v759_v37, %v695_v36  ;;  %v887_v42 = vld [vmem:[%s2905_s27 + $0x100] sm:$0xff] }
 0x12c   : > { %v1716_v10 = vsub.f32 %v1587_v56, %v1652_v61  ;;  %v1013_v14 = vld [vmem:[%s2908_s3 + $0xf0] sm:$0xff]  ;;  %v1269_v19 = vadd.f32 %v1205_v9, %v1141_v8  ;;  %v1206_v28 = vld [vmem:[%s2918_s23 + $0xf8] sm:$0xff]  ;;  %v950_v39 = vadd.f32 %v886_v22, %v822_v26  ;;  %v1143_v43 = vld [vmem:[%s2915_s1 + $0x100] sm:$0xff] }
 0x12d   : > { %v1333_v15 = vld [vmem:[%s2925_s24 + $0xf0] sm:$0xff]  ;;  %v1334_v29 = vld [vmem:[%s2925_s24 + $0xf8] sm:$0xff]  ;;  %v1717_v30 = vsub.f32 %v1588_v11, %v1653_v17  ;;  %v1077_v31 = vadd.f32 %v1013_v14, %v949_v18  ;;  %v1270_v35 = vadd.f32 %v1206_v28, %v1142_v27  ;;  %v1654_v38 = vmul.f32 %v2958_v32, %v1524_v23  ;;  %v1015_v47 = vld [vmem:[%s2908_s3 + $0x100] sm:$0xff] }
 0x12e   : > { %v1461_v20 = vld [vmem:[%s2929_s25 + $0xf0] sm:$0xff]  ;;  %1780 = vst [vmem:[%s2979_s2 + $0xd8] sm:$0xff] %v1716_v10  ;;  %v1397_v33 = vadd.f32 %v1333_v15, %v1269_v19  ;;  %v1014_v34 = vld [vmem:[%s2908_s3 + $0xf8] sm:$0xff]  ;;  %v1207_v48 = vld [vmem:[%s2918_s23 + $0x100] sm:$0xff]  ;;  %v951_v52 = vadd.f32 %v887_v42, %v823_v41 }
 0x12f   : > { %v1462_v40 = vld [vmem:[%s2929_s25 + $0xf8] sm:$0xff]  ;;  %1781 = vst [vmem:[%s2979_s2 + $0xe0] sm:$0xff] %v1717_v30  ;;  %v1590_v45 = vmul.f32 %v2952_v25, %v1077_v31  ;;  %v1398_v46 = vadd.f32 %v1334_v29, %v1270_v35  ;;  %v1335_v49 = vld [vmem:[%s2925_s24 + $0x100] sm:$0xff]  ;;  %v1718_v50 = vsub.f32 %v1589_v24, %v1654_v38  ;;  %v1078_v51 = vadd.f32 %v1014_v34, %v950_v39  ;;  %v696_v54 = vld [vmem:[%s2890_s20 + $0x108] sm:$0xff] }
 0x130   : > { %v1525_v44 = vadd.f32 %v1461_v20, %v1397_v33  ;;  %v1271_v53 = vadd.f32 %v1207_v48, %v1143_v43  ;;  %v760_v55 = vld [vmem:[%s2898_s13 + $0x108] sm:$0xff]  ;;  %v1463_v59 = vld [vmem:[%s2929_s25 + $0x100] sm:$0xff]  ;;  %v1079_v0 = vadd.f32 %v1015_v47, %v951_v52  ;;  %v697_v5 = vld [vmem:[%s2890_s20 + $0x110] sm:$0xff] }
 0x131   : > { %v888_v56 = vld [vmem:[%s2905_s27 + $0x108] sm:$0xff]  ;;  %v1526_v58 = vadd.f32 %v1462_v40, %v1398_v46  ;;  %v824_v60 = vadd.f32 %v760_v55, %v696_v54  ;;  %1782 = vst [vmem:[%s2979_s2 + $0xe8] sm:$0xff] %v1718_v50  ;;  %v1591_v63 = vmul.f32 %v2952_v25, %v1078_v51  ;;  %v761_v10 = vld [vmem:[%s2898_s13 + $0x110] sm:$0xff]  ;;  %v698_v23 = vld [vmem:[%s2890_s20 + $0x118] sm:$0xff] }
 0x132   : > { %v1655_v57 = vmul.f32 %v2958_v32, %v1525_v44  ;;  %v1144_v61 = vld [vmem:[%s2915_s1 + $0x108] sm:$0xff]  ;;  %v1399_v1 = vadd.f32 %v1335_v49, %v1271_v53  ;;  %v889_v11 = vld [vmem:[%s2905_s27 + $0x110] sm:$0xff]  ;;  %v1592_v13 = vmul.f32 %v2952_v25, %v1079_v0  ;;  %v825_v15 = vadd.f32 %v761_v10, %v697_v5  ;;  %v762_v24 = vld [vmem:[%s2898_s13 + $0x118] sm:$0xff] }
 0x133   : > { %v1208_v62 = vld [vmem:[%s2918_s23 + $0x108] sm:$0xff]  ;;  %v1656_v7 = vmul.f32 %v2958_v32, %v1526_v58  ;;  %v952_v8 = vadd.f32 %v888_v56, %v824_v60  ;;  %v1145_v16 = vld [vmem:[%s2915_s1 + $0x110] sm:$0xff]  ;;  %v826_v30 = vadd.f32 %v762_v24, %v698_v23  ;;  %v890_v31 = vld [vmem:[%s2905_s27 + $0x118] sm:$0xff] }
 0x134   : > { %v1016_v2 = vld [vmem:[%s2908_s3 + $0x108] sm:$0xff]  ;;  %v1272_v3 = vadd.f32 %v1208_v62, %v1144_v61  ;;  %v1719_v6 = vsub.f32 %v1590_v45, %v1655_v57  ;;  %v1527_v12 = vadd.f32 %v1463_v59, %v1399_v1  ;;  %v1209_v17 = vld [vmem:[%s2918_s23 + $0x110] sm:$0xff]  ;;  %v953_v28 = vadd.f32 %v889_v11, %v825_v15  ;;  %v1146_v33 = vld [vmem:[%s2915_s1 + $0x118] sm:$0xff] }
 0x135   : > { %v1336_v4 = vld [vmem:[%s2925_s24 + $0x108] sm:$0xff]  ;;  %v1337_v18 = vld [vmem:[%s2925_s24 + $0x110] sm:$0xff]  ;;  %v1720_v19 = vsub.f32 %v1591_v63, %v1656_v7  ;;  %v1080_v20 = vadd.f32 %v1016_v2, %v952_v8  ;;  %v1273_v22 = vadd.f32 %v1209_v17, %v1145_v16  ;;  %v1018_v36 = vld [vmem:[%s2908_s3 + $0x118] sm:$0xff]  ;;  %v954_v42 = vadd.f32 %v890_v31, %v826_v30 }
 0x136   : > { %v1464_v9 = vld [vmem:[%s2929_s25 + $0x108] sm:$0xff]  ;;  %v1400_v14 = vadd.f32 %v1336_v4, %v1272_v3  ;;  %1783 = vst [vmem:[%s2979_s2 + $0xf0] sm:$0xff] %v1719_v6  ;;  %v1017_v21 = vld [vmem:[%s2908_s3 + $0x110] sm:$0xff]  ;;  %v1657_v26 = vmul.f32 %v2958_v32, %v1527_v12  ;;  %v1210_v37 = vld [vmem:[%s2918_s23 + $0x118] sm:$0xff] }
 0x137   : > { %v1465_v29 = vld [vmem:[%s2929_s25 + $0x110] sm:$0xff]  ;;  %1784 = vst [vmem:[%s2979_s2 + $0xf8] sm:$0xff] %v1720_v19  ;;  %v1593_v34 = vmul.f32 %v2952_v25, %v1080_v20  ;;  %v1401_v35 = vadd.f32 %v1337_v18, %v1273_v22  ;;  %v1338_v38 = vld [vmem:[%s2925_s24 + $0x118] sm:$0xff]  ;;  %v1081_v41 = vadd.f32 %v1017_v21, %v953_v28  ;;  %v699_v43 = vld [vmem:[%s2890_s20 + $0x120] sm:$0xff]  ;;  %v1274_v47 = vadd.f32 %v1210_v37, %v1146_v33 }
 0x138   : > { %v1528_v27 = vadd.f32 %v1464_v9, %v1400_v14  ;;  %v1721_v39 = vsub.f32 %v1592_v13, %v1657_v26  ;;  %v763_v44 = vld [vmem:[%s2898_s13 + $0x120] sm:$0xff]  ;;  %v1466_v48 = vld [vmem:[%s2929_s25 + $0x118] sm:$0xff]  ;;  %v1082_v54 = vadd.f32 %v1018_v36, %v954_v42  ;;  %v700_v58 = vld [vmem:[%s2890_s20 + $0x128] sm:$0xff] }
 0x139   : > { %v891_v45 = vld [vmem:[%s2905_s27 + $0x120] sm:$0xff]  ;;  %v1529_v46 = vadd.f32 %v1465_v29, %v1401_v35  ;;  %v827_v49 = vadd.f32 %v763_v44, %v699_v43  ;;  %v1594_v53 = vmul.f32 %v2952_v25, %v1081_v41  ;;  %v1402_v60 = vadd.f32 %v1338_v38, %v1274_v47  ;;  %v764_v63 = vld [vmem:[%s2898_s13 + $0x128] sm:$0xff]  ;;  %v701_v12 = vld [vmem:[%s2890_s20 + $0x130] sm:$0xff] }
 0x13a   : > { %v1658_v40 = vmul.f32 %v2958_v32, %v1528_v27  ;;  %v1147_v50 = vld [vmem:[%s2915_s1 + $0x120] sm:$0xff]  ;;  %1785 = vst [vmem:[%s2979_s2 + $0x100] sm:$0xff] %v1721_v39  ;;  %v892_v0 = vld [vmem:[%s2905_s27 + $0x128] sm:$0xff]  ;;  %v1595_v1 = vmul.f32 %v2952_v25, %v1082_v54  ;;  %v828_v3 = vadd.f32 %v764_v63, %v700_v58  ;;  %v765_v13 = vld [vmem:[%s2898_s13 + $0x130] sm:$0xff] }
 0x13b   : > { %v1211_v51 = vld [vmem:[%s2918_s23 + $0x120] sm:$0xff]  ;;  %v1659_v59 = vmul.f32 %v2958_v32, %v1529_v46  ;;  %v955_v61 = vadd.f32 %v891_v45, %v827_v49  ;;  %v1148_v4 = vld [vmem:[%s2915_s1 + $0x128] sm:$0xff]  ;;  %v1530_v8 = vadd.f32 %v1466_v48, %v1402_v60  ;;  %v829_v17 = vadd.f32 %v765_v13, %v701_v12  ;;  %v893_v18 = vld [vmem:[%s2905_s27 + $0x130] sm:$0xff] }
 0x13c   : > { %v1722_v52 = vsub.f32 %v1593_v34, %v1658_v40  ;;  %v1019_v55 = vld [vmem:[%s2908_s3 + $0x120] sm:$0xff]  ;;  %v1275_v56 = vadd.f32 %v1211_v51, %v1147_v50  ;;  %v1212_v5 = vld [vmem:[%s2918_s23 + $0x128] sm:$0xff]  ;;  %v956_v15 = vadd.f32 %v892_v0, %v828_v3  ;;  %v1149_v19 = vld [vmem:[%s2915_s1 + $0x130] sm:$0xff] }
 0x13d   : > { %v1339_v57 = vld [vmem:[%s2925_s24 + $0x120] sm:$0xff]  ;;  %v1340_v6 = vld [vmem:[%s2925_s24 + $0x128] sm:$0xff]  ;;  %v1723_v7 = vsub.f32 %v1594_v53, %v1659_v59  ;;  %v1083_v9 = vadd.f32 %v1019_v55, %v955_v61  ;;  %v1276_v11 = vadd.f32 %v1212_v5, %v1148_v4  ;;  %v1660_v20 = vmul.f32 %v2958_v32, %v1530_v8  ;;  %v1021_v23 = vld [vmem:[%s2908_s3 + $0x130] sm:$0xff] }
 0x13e   : > { %v1467_v62 = vld [vmem:[%s2929_s25 + $0x120] sm:$0xff]  ;;  %1786 = vst [vmem:[%s2979_s2 + $0x108] sm:$0xff] %v1722_v52  ;;  %v1403_v2 = vadd.f32 %v1339_v57, %v1275_v56  ;;  %v1020_v10 = vld [vmem:[%s2908_s3 + $0x128] sm:$0xff]  ;;  %v1213_v24 = vld [vmem:[%s2918_s23 + $0x130] sm:$0xff]  ;;  %v957_v29 = vadd.f32 %v893_v18, %v829_v17 }
 0x13f   : > { %v1468_v16 = vld [vmem:[%s2929_s25 + $0x128] sm:$0xff]  ;;  %1787 = vst [vmem:[%s2979_s2 + $0x110] sm:$0xff] %v1723_v7  ;;  %v1596_v21 = vmul.f32 %v2952_v25, %v1083_v9  ;;  %v1404_v22 = vadd.f32 %v1340_v6, %v1276_v11  ;;  %v1341_v26 = vld [vmem:[%s2925_s24 + $0x130] sm:$0xff]  ;;  %v1084_v28 = vadd.f32 %v1020_v10, %v956_v15  ;;  %v1277_v30 = vadd.f32 %v1213_v24, %v1149_v19  ;;  %v702_v31 = vld [vmem:[%s2890_s20 + $0x138] sm:$0xff] }
 0x140   : > { %v1531_v14 = vadd.f32 %v1467_v62, %v1403_v2  ;;  %v766_v33 = vld [vmem:[%s2898_s13 + $0x138] sm:$0xff]  ;;  %v1724_v35 = vsub.f32 %v1595_v1, %v1660_v20  ;;  %v1469_v37 = vld [vmem:[%s2929_s25 + $0x130] sm:$0xff]  ;;  %v1085_v43 = vadd.f32 %v1021_v23, %v957_v29  ;;  %v703_v47 = vld [vmem:[%s2890_s20 + $0x140] sm:$0xff] }
 0x141   : > { %v894_v34 = vld [vmem:[%s2905_s27 + $0x138] sm:$0xff]  ;;  %v1532_v36 = vadd.f32 %v1468_v16, %v1404_v22  ;;  %v830_v38 = vadd.f32 %v766_v33, %v702_v31  ;;  %v1597_v42 = vmul.f32 %v2952_v25, %v1084_v28  ;;  %v1405_v44 = vadd.f32 %v1341_v26, %v1277_v30  ;;  %v767_v52 = vld [vmem:[%s2898_s13 + $0x140] sm:$0xff]  ;;  %v704_v1 = vld [vmem:[%s2890_s20 + $0x148] sm:$0xff] }
 0x142   : > { %v1661_v27 = vmul.f32 %v2958_v32, %v1531_v14  ;;  %v1150_v39 = vld [vmem:[%s2915_s1 + $0x138] sm:$0xff]  ;;  %1788 = vst [vmem:[%s2979_s2 + $0x118] sm:$0xff] %v1724_v35  ;;  %v895_v53 = vld [vmem:[%s2905_s27 + $0x140] sm:$0xff]  ;;  %v1598_v55 = vmul.f32 %v2952_v25, %v1085_v43  ;;  %v831_v56 = vadd.f32 %v767_v52, %v703_v47  ;;  %v768_v2 = vld [vmem:[%s2898_s13 + $0x148] sm:$0xff] }
 0x143   : > { %v1214_v40 = vld [vmem:[%s2918_s23 + $0x138] sm:$0xff]  ;;  %v1662_v48 = vmul.f32 %v2958_v32, %v1532_v36  ;;  %v958_v49 = vadd.f32 %v894_v34, %v830_v38  ;;  %v1533_v54 = vadd.f32 %v1469_v37, %v1405_v44  ;;  %v1151_v57 = vld [vmem:[%s2915_s1 + $0x140] sm:$0xff]  ;;  %v832_v6 = vadd.f32 %v768_v2, %v704_v1  ;;  %v896_v7 = vld [vmem:[%s2905_s27 + $0x148] sm:$0xff] }
 0x144   : > { %v1725_v41 = vsub.f32 %v1596_v21, %v1661_v27  ;;  %v1022_v45 = vld [vmem:[%s2908_s3 + $0x138] sm:$0xff]  ;;  %v1278_v50 = vadd.f32 %v1214_v40, %v1150_v39  ;;  %v1215_v58 = vld [vmem:[%s2918_s23 + $0x140] sm:$0xff]  ;;  %v959_v4 = vadd.f32 %v895_v53, %v831_v56  ;;  %v1152_v8 = vld [vmem:[%s2915_s1 + $0x148] sm:$0xff] }
 0x145   : > { %v1342_v46 = vld [vmem:[%s2925_s24 + $0x138] sm:$0xff]  ;;  %v1343_v59 = vld [vmem:[%s2925_s24 + $0x140] sm:$0xff]  ;;  %v1726_v60 = vsub.f32 %v1597_v42, %v1662_v48  ;;  %v1086_v61 = vadd.f32 %v1022_v45, %v958_v49  ;;  %v1279_v0 = vadd.f32 %v1215_v58, %v1151_v57  ;;  %v1663_v3 = vmul.f32 %v2958_v32, %v1533_v54  ;;  %v1024_v12 = vld [vmem:[%s2908_s3 + $0x148] sm:$0xff] }
 0x146   : > { %v1470_v51 = vld [vmem:[%s2929_s25 + $0x138] sm:$0xff]  ;;  %1789 = vst [vmem:[%s2979_s2 + $0x120] sm:$0xff] %v1725_v41  ;;  %v1406_v62 = vadd.f32 %v1342_v46, %v1278_v50  ;;  %v1023_v63 = vld [vmem:[%s2908_s3 + $0x140] sm:$0xff]  ;;  %v1216_v13 = vld [vmem:[%s2918_s23 + $0x148] sm:$0xff]  ;;  %v960_v17 = vadd.f32 %v896_v7, %v832_v6 }
 0x147   : > { %v1471_v5 = vld [vmem:[%s2929_s25 + $0x140] sm:$0xff]  ;;  %1790 = vst [vmem:[%s2979_s2 + $0x128] sm:$0xff] %v1726_v60  ;;  %v1599_v10 = vmul.f32 %v2952_v25, %v1086_v61  ;;  %v1407_v11 = vadd.f32 %v1343_v59, %v1279_v0  ;;  %v1344_v14 = vld [vmem:[%s2925_s24 + $0x148] sm:$0xff]  ;;  %v1727_v15 = vsub.f32 %v1598_v55, %v1663_v3  ;;  %v1087_v16 = vadd.f32 %v1023_v63, %v959_v4  ;;  %v705_v19 = vld [vmem:[%s2890_s20 + $0x150] sm:$0xff] }
 0x148   : > { %v1534_v9 = vadd.f32 %v1470_v51, %v1406_v62  ;;  %v1280_v18 = vadd.f32 %v1216_v13, %v1152_v8  ;;  %v769_v20 = vld [vmem:[%s2898_s13 + $0x150] sm:$0xff]  ;;  %v1472_v24 = vld [vmem:[%s2929_s25 + $0x148] sm:$0xff]  ;;  %v1088_v30 = vadd.f32 %v1024_v12, %v960_v17  ;;  %v706_v36 = vld [vmem:[%s2890_s20 + $0x158] sm:$0xff] }
 0x149   : > { %v897_v21 = vld [vmem:[%s2905_s27 + $0x150] sm:$0xff]  ;;  %v1535_v23 = vadd.f32 %v1471_v5, %v1407_v11  ;;  %v833_v26 = vadd.f32 %v769_v20, %v705_v19  ;;  %1791 = vst [vmem:[%s2979_s2 + $0x130] sm:$0xff] %v1727_v15  ;;  %v1600_v29 = vmul.f32 %v2952_v25, %v1087_v16  ;;  %v770_v41 = vld [vmem:[%s2898_s13 + $0x158] sm:$0xff]  ;;  %v707_v54 = vld [vmem:[%s2890_s20 + $0x160] sm:$0xff] }
 0x14a   : > { %v1664_v22 = vmul.f32 %v2958_v32, %v1534_v9  ;;  %v1153_v27 = vld [vmem:[%s2915_s1 + $0x150] sm:$0xff]  ;;  %v1408_v31 = vadd.f32 %v1344_v14, %v1280_v18  ;;  %v898_v42 = vld [vmem:[%s2905_s27 + $0x158] sm:$0xff]  ;;  %v1601_v44 = vmul.f32 %v2952_v25, %v1088_v30  ;;  %v834_v46 = vadd.f32 %v770_v41, %v706_v36  ;;  %v771_v55 = vld [vmem:[%s2898_s13 + $0x160] sm:$0xff] }
 0x14b   : > { %v1217_v28 = vld [vmem:[%s2918_s23 + $0x150] sm:$0xff]  ;;  %v1665_v38 = vmul.f32 %v2958_v32, %v1535_v23  ;;  %v961_v39 = vadd.f32 %v897_v21, %v833_v26  ;;  %v1154_v47 = vld [vmem:[%s2915_s1 + $0x158] sm:$0xff]  ;;  %v835_v60 = vadd.f32 %v771_v55, %v707_v54  ;;  %v899_v61 = vld [vmem:[%s2905_s27 + $0x160] sm:$0xff] }
 0x14c   : > { %v1025_v33 = vld [vmem:[%s2908_s3 + $0x150] sm:$0xff]  ;;  %v1281_v34 = vadd.f32 %v1217_v28, %v1153_v27  ;;  %v1728_v37 = vsub.f32 %v1599_v10, %v1664_v22  ;;  %v1536_v43 = vadd.f32 %v1472_v24, %v1408_v31  ;;  %v1218_v48 = vld [vmem:[%s2918_s23 + $0x158] sm:$0xff]  ;;  %v962_v58 = vadd.f32 %v898_v42, %v834_v46  ;;  %v1155_v62 = vld [vmem:[%s2915_s1 + $0x160] sm:$0xff] }
 0x14d   : > { %v1345_v35 = vld [vmem:[%s2925_s24 + $0x150] sm:$0xff]  ;;  %v1346_v49 = vld [vmem:[%s2925_s24 + $0x158] sm:$0xff]  ;;  %v1729_v50 = vsub.f32 %v1600_v29, %v1665_v38  ;;  %v1089_v51 = vadd.f32 %v1025_v33, %v961_v39  ;;  %v1282_v53 = vadd.f32 %v1218_v48, %v1154_v47  ;;  %v1027_v1 = vld [vmem:[%s2908_s3 + $0x160] sm:$0xff]  ;;  %v963_v7 = vadd.f32 %v899_v61, %v835_v60 }
 0x14e   : > { %v1473_v40 = vld [vmem:[%s2929_s25 + $0x150] sm:$0xff]  ;;  %v1409_v45 = vadd.f32 %v1345_v35, %v1281_v34  ;;  %1792 = vst [vmem:[%s2979_s2 + $0x138] sm:$0xff] %v1728_v37  ;;  %v1026_v52 = vld [vmem:[%s2908_s3 + $0x158] sm:$0xff]  ;;  %v1666_v56 = vmul.f32 %v2958_v32, %v1536_v43  ;;  %v1219_v2 = vld [vmem:[%s2918_s23 + $0x160] sm:$0xff] }
 0x14f   : > { %v1474_v59 = vld [vmem:[%s2929_s25 + $0x158] sm:$0xff]  ;;  %1793 = vst [vmem:[%s2979_s2 + $0x140] sm:$0xff] %v1729_v50  ;;  %v1602_v63 = vmul.f32 %v2952_v25, %v1089_v51  ;;  %v1410_v0 = vadd.f32 %v1346_v49, %v1282_v53  ;;  %v1347_v3 = vld [vmem:[%s2925_s24 + $0x160] sm:$0xff]  ;;  %v1090_v6 = vadd.f32 %v1026_v52, %v962_v58  ;;  %v708_v8 = vld [vmem:[%s2890_s20 + $0x168] sm:$0xff]  ;;  %v1283_v12 = vadd.f32 %v1219_v2, %v1155_v62 }
 0x150   : > { %v1537_v57 = vadd.f32 %v1473_v40, %v1409_v45  ;;  %v1730_v4 = vsub.f32 %v1601_v44, %v1666_v56  ;;  %v772_v9 = vld [vmem:[%s2898_s13 + $0x168] sm:$0xff]  ;;  %v1475_v13 = vld [vmem:[%s2929_s25 + $0x160] sm:$0xff]  ;;  %v1091_v19 = vadd.f32 %v1027_v1, %v963_v7  ;;  %v709_v23 = vld [vmem:[%s2890_s20 + $0x170] sm:$0xff] }
 0x151   : > { %v900_v10 = vld [vmem:[%s2905_s27 + $0x168] sm:$0xff]  ;;  %v1538_v11 = vadd.f32 %v1474_v59, %v1410_v0  ;;  %v836_v14 = vadd.f32 %v772_v9, %v708_v8  ;;  %v1603_v18 = vmul.f32 %v2952_v25, %v1090_v6  ;;  %v1411_v26 = vadd.f32 %v1347_v3, %v1283_v12  ;;  %v773_v29 = vld [vmem:[%s2898_s13 + $0x170] sm:$0xff]  ;;  %v710_v43 = vld [vmem:[%s2890_s20 + $0x178] sm:$0xff] }
 0x152   : > { %v1667_v5 = vmul.f32 %v2958_v32, %v1537_v57  ;;  %v1156_v15 = vld [vmem:[%s2915_s1 + $0x168] sm:$0xff]  ;;  %1794 = vst [vmem:[%s2979_s2 + $0x148] sm:$0xff] %v1730_v4  ;;  %v901_v30 = vld [vmem:[%s2905_s27 + $0x170] sm:$0xff]  ;;  %v1604_v31 = vmul.f32 %v2952_v25, %v1091_v19  ;;  %v837_v34 = vadd.f32 %v773_v29, %v709_v23  ;;  %v774_v44 = vld [vmem:[%s2898_s13 + $0x178] sm:$0xff] }
 0x153   : > { %v1220_v16 = vld [vmem:[%s2918_s23 + $0x168] sm:$0xff]  ;;  %v1668_v24 = vmul.f32 %v2958_v32, %v1538_v11  ;;  %v964_v27 = vadd.f32 %v900_v10, %v836_v14  ;;  %v1157_v35 = vld [vmem:[%s2915_s1 + $0x170] sm:$0xff]  ;;  %v1539_v39 = vadd.f32 %v1475_v13, %v1411_v26  ;;  %v838_v48 = vadd.f32 %v774_v44, %v710_v43  ;;  %v902_v49 = vld [vmem:[%s2905_s27 + $0x178] sm:$0xff] }
 0x154   : > { %v1731_v17 = vsub.f32 %v1602_v63, %v1667_v5  ;;  %v1028_v20 = vld [vmem:[%s2908_s3 + $0x168] sm:$0xff]  ;;  %v1284_v21 = vadd.f32 %v1220_v16, %v1156_v15  ;;  %v1221_v36 = vld [vmem:[%s2918_s23 + $0x170] sm:$0xff]  ;;  %v965_v46 = vadd.f32 %v901_v30, %v837_v34  ;;  %v1158_v50 = vld [vmem:[%s2915_s1 + $0x178] sm:$0xff] }
 0x155   : > { %v1348_v22 = vld [vmem:[%s2925_s24 + $0x168] sm:$0xff]  ;;  %v1349_v37 = vld [vmem:[%s2925_s24 + $0x170] sm:$0xff]  ;;  %v1732_v38 = vsub.f32 %v1603_v18, %v1668_v24  ;;  %v1092_v40 = vadd.f32 %v1028_v20, %v964_v27  ;;  %v1285_v42 = vadd.f32 %v1221_v36, %v1157_v35  ;;  %v1669_v51 = vmul.f32 %v2958_v32, %v1539_v39  ;;  %v1030_v54 = vld [vmem:[%s2908_s3 + $0x178] sm:$0xff] }
 0x156   : > { %v1476_v28 = vld [vmem:[%s2929_s25 + $0x168] sm:$0xff]  ;;  %1795 = vst [vmem:[%s2979_s2 + $0x150] sm:$0xff] %v1731_v17  ;;  %v1412_v33 = vadd.f32 %v1348_v22, %v1284_v21  ;;  %v1029_v41 = vld [vmem:[%s2908_s3 + $0x170] sm:$0xff]  ;;  %v1222_v55 = vld [vmem:[%s2918_s23 + $0x178] sm:$0xff]  ;;  %v966_v59 = vadd.f32 %v902_v49, %v838_v48 }
 0x157   : > { %v1477_v47 = vld [vmem:[%s2929_s25 + $0x170] sm:$0xff]  ;;  %1796 = vst [vmem:[%s2979_s2 + $0x158] sm:$0xff] %v1732_v38  ;;  %v1605_v52 = vmul.f32 %v2952_v25, %v1092_v40  ;;  %v1413_v53 = vadd.f32 %v1349_v37, %v1285_v42  ;;  %v1350_v56 = vld [vmem:[%s2925_s24 + $0x178] sm:$0xff]  ;;  %v1093_v58 = vadd.f32 %v1029_v41, %v965_v46  ;;  %v1286_v60 = vadd.f32 %v1222_v55, %v1158_v50  ;;  %v711_v61 = vld [vmem:[%s2890_s20 + $0x180] sm:$0xff] }
 0x158   : > { %v1540_v45 = vadd.f32 %v1476_v28, %v1412_v33  ;;  %v775_v62 = vld [vmem:[%s2898_s13 + $0x180] sm:$0xff]  ;;  %v1733_v0 = vsub.f32 %v1604_v31, %v1669_v51  ;;  %v1478_v2 = vld [vmem:[%s2929_s25 + $0x178] sm:$0xff]  ;;  %v1094_v8 = vadd.f32 %v1030_v54, %v966_v59  ;;  %v712_v12 = vld [vmem:[%s2890_s20 + $0x188] sm:$0xff] }
 0x159   : > { %v903_v63 = vld [vmem:[%s2905_s27 + $0x180] sm:$0xff]  ;;  %v1541_v1 = vadd.f32 %v1477_v47, %v1413_v53  ;;  %v839_v3 = vadd.f32 %v775_v62, %v711_v61  ;;  %v1606_v7 = vmul.f32 %v2952_v25, %v1093_v58  ;;  %v1414_v9 = vadd.f32 %v1350_v56, %v1286_v60  ;;  %v776_v17 = vld [vmem:[%s2898_s13 + $0x188] sm:$0xff]  ;;  %v713_v31 = vld [vmem:[%s2890_s20 + $0x190] sm:$0xff] }
 0x15a   : > { %v1670_v57 = vmul.f32 %v2958_v32, %v1540_v45  ;;  %v1159_v4 = vld [vmem:[%s2915_s1 + $0x180] sm:$0xff]  ;;  %1797 = vst [vmem:[%s2979_s2 + $0x160] sm:$0xff] %v1733_v0  ;;  %v904_v18 = vld [vmem:[%s2905_s27 + $0x188] sm:$0xff]  ;;  %v1607_v20 = vmul.f32 %v2952_v25, %v1094_v8  ;;  %v840_v21 = vadd.f32 %v776_v17, %v712_v12  ;;  %v777_v33 = vld [vmem:[%s2898_s13 + $0x190] sm:$0xff] }
 0x15b   : > { %v1223_v5 = vld [vmem:[%s2918_s23 + $0x180] sm:$0xff]  ;;  %v1671_v13 = vmul.f32 %v2958_v32, %v1541_v1  ;;  %v967_v14 = vadd.f32 %v903_v63, %v839_v3  ;;  %v1542_v19 = vadd.f32 %v1478_v2, %v1414_v9  ;;  %v1160_v22 = vld [vmem:[%s2915_s1 + $0x188] sm:$0xff]  ;;  %v841_v37 = vadd.f32 %v777_v33, %v713_v31  ;;  %v905_v38 = vld [vmem:[%s2905_s27 + $0x190] sm:$0xff] }
 0x15c   : > { %v1734_v6 = vsub.f32 %v1605_v52, %v1670_v57  ;;  %v1031_v10 = vld [vmem:[%s2908_s3 + $0x180] sm:$0xff]  ;;  %v1287_v15 = vadd.f32 %v1223_v5, %v1159_v4  ;;  %v1224_v23 = vld [vmem:[%s2918_s23 + $0x188] sm:$0xff]  ;;  %v968_v35 = vadd.f32 %v904_v18, %v840_v21  ;;  %v1161_v39 = vld [vmem:[%s2915_s1 + $0x190] sm:$0xff] }
 0x15d   : > { %v1351_v11 = vld [vmem:[%s2925_s24 + $0x180] sm:$0xff]  ;;  %v1352_v24 = vld [vmem:[%s2925_s24 + $0x188] sm:$0xff]  ;;  %v1735_v26 = vsub.f32 %v1606_v7, %v1671_v13  ;;  %v1095_v27 = vadd.f32 %v1031_v10, %v967_v14  ;;  %v1288_v30 = vadd.f32 %v1224_v23, %v1160_v22  ;;  %v1672_v34 = vmul.f32 %v2958_v32, %v1542_v19  ;;  %v1033_v43 = vld [vmem:[%s2908_s3 + $0x190] sm:$0xff] }
 0x15e   : > { %v1479_v16 = vld [vmem:[%s2929_s25 + $0x180] sm:$0xff]  ;;  %1798 = vst [vmem:[%s2979_s2 + $0x168] sm:$0xff] %v1734_v6  ;;  %v1415_v28 = vadd.f32 %v1351_v11, %v1287_v15  ;;  %v1032_v29 = vld [vmem:[%s2908_s3 + $0x188] sm:$0xff]  ;;  %v1225_v44 = vld [vmem:[%s2918_s23 + $0x190] sm:$0xff]  ;;  %v969_v48 = vadd.f32 %v905_v38, %v841_v37 }
 0x15f   : > { %v1480_v36 = vld [vmem:[%s2929_s25 + $0x188] sm:$0xff]  ;;  %1799 = vst [vmem:[%s2979_s2 + $0x170] sm:$0xff] %v1735_v26  ;;  %v1608_v41 = vmul.f32 %v2952_v25, %v1095_v27  ;;  %v1416_v42 = vadd.f32 %v1352_v24, %v1288_v30  ;;  %v1353_v45 = vld [vmem:[%s2925_s24 + $0x190] sm:$0xff]  ;;  %v1736_v46 = vsub.f32 %v1607_v20, %v1672_v34  ;;  %v1096_v47 = vadd.f32 %v1032_v29, %v968_v35  ;;  %v714_v50 = vld [vmem:[%s2890_s20 + $0x198] sm:$0xff] }
 0x160   : > { %v1543_v40 = vadd.f32 %v1479_v16, %v1415_v28  ;;  %v1289_v49 = vadd.f32 %v1225_v44, %v1161_v39  ;;  %v778_v51 = vld [vmem:[%s2898_s13 + $0x198] sm:$0xff]  ;;  %v1481_v55 = vld [vmem:[%s2929_s25 + $0x190] sm:$0xff]  ;;  %v1097_v60 = vadd.f32 %v1033_v43, %v969_v48  ;;  %v715_v1 = vld [vmem:[%s2890_s20 + $0x1a0] sm:$0xff] }
 0x161   : > { %v906_v52 = vld [vmem:[%s2905_s27 + $0x198] sm:$0xff]  ;;  %v1544_v54 = vadd.f32 %v1480_v36, %v1416_v42  ;;  %v842_v56 = vadd.f32 %v778_v51, %v714_v50  ;;  %1800 = vst [vmem:[%s2979_s2 + $0x178] sm:$0xff] %v1736_v46  ;;  %v1609_v59 = vmul.f32 %v2952_v25, %v1096_v47  ;;  %v779_v6 = vld [vmem:[%s2898_s13 + $0x1a0] sm:$0xff]  ;;  %v716_v19 = vld [vmem:[%s2890_s20 + $0x1a8] sm:$0xff] }
 0x162   : > { %v1673_v53 = vmul.f32 %v2958_v32, %v1543_v40  ;;  %v1162_v57 = vld [vmem:[%s2915_s1 + $0x198] sm:$0xff]  ;;  %v1417_v61 = vadd.f32 %v1353_v45, %v1289_v49  ;;  %v907_v7 = vld [vmem:[%s2905_s27 + $0x1a0] sm:$0xff]  ;;  %v1610_v9 = vmul.f32 %v2952_v25, %v1097_v60  ;;  %v843_v11 = vadd.f32 %v779_v6, %v715_v1  ;;  %v780_v20 = vld [vmem:[%s2898_s13 + $0x1a8] sm:$0xff] }
 0x163   : > { %v1226_v58 = vld [vmem:[%s2918_s23 + $0x198] sm:$0xff]  ;;  %v1674_v3 = vmul.f32 %v2958_v32, %v1544_v54  ;;  %v970_v4 = vadd.f32 %v906_v52, %v842_v56  ;;  %v1163_v12 = vld [vmem:[%s2915_s1 + $0x1a0] sm:$0xff]  ;;  %v844_v26 = vadd.f32 %v780_v20, %v716_v19  ;;  %v908_v27 = vld [vmem:[%s2905_s27 + $0x1a8] sm:$0xff] }
 0x164   : > { %v1034_v62 = vld [vmem:[%s2908_s3 + $0x198] sm:$0xff]  ;;  %v1290_v63 = vadd.f32 %v1226_v58, %v1162_v57  ;;  %v1737_v2 = vsub.f32 %v1608_v41, %v1673_v53  ;;  %v1545_v8 = vadd.f32 %v1481_v55, %v1417_v61  ;;  %v1227_v13 = vld [vmem:[%s2918_s23 + $0x1a0] sm:$0xff]  ;;  %v971_v23 = vadd.f32 %v907_v7, %v843_v11  ;;  %v1164_v28 = vld [vmem:[%s2915_s1 + $0x1a8] sm:$0xff] }
 0x165   : > { %v1354_v0 = vld [vmem:[%s2925_s24 + $0x198] sm:$0xff]  ;;  %v1355_v14 = vld [vmem:[%s2925_s24 + $0x1a0] sm:$0xff]  ;;  %v1738_v15 = vsub.f32 %v1609_v59, %v1674_v3  ;;  %v1098_v16 = vadd.f32 %v1034_v62, %v970_v4  ;;  %v1291_v18 = vadd.f32 %v1227_v13, %v1163_v12  ;;  %v1036_v31 = vld [vmem:[%s2908_s3 + $0x1a8] sm:$0xff]  ;;  %v972_v38 = vadd.f32 %v908_v27, %v844_v26 }
 0x166   : > { %v1482_v5 = vld [vmem:[%s2929_s25 + $0x198] sm:$0xff]  ;;  %v1418_v10 = vadd.f32 %v1354_v0, %v1290_v63  ;;  %1801 = vst [vmem:[%s2979_s2 + $0x180] sm:$0xff] %v1737_v2  ;;  %v1035_v17 = vld [vmem:[%s2908_s3 + $0x1a0] sm:$0xff]  ;;  %v1675_v21 = vmul.f32 %v2958_v32, %v1545_v8  ;;  %v1228_v33 = vld [vmem:[%s2918_s23 + $0x1a8] sm:$0xff] }
 0x167   : > { %v1483_v24 = vld [vmem:[%s2929_s25 + $0x1a0] sm:$0xff]  ;;  %1802 = vst [vmem:[%s2979_s2 + $0x188] sm:$0xff] %v1738_v15  ;;  %v1611_v29 = vmul.f32 %v2952_v25, %v1098_v16  ;;  %v1419_v30 = vadd.f32 %v1355_v14, %v1291_v18  ;;  %v1356_v34 = vld [vmem:[%s2925_s24 + $0x1a8] sm:$0xff]  ;;  %v1099_v37 = vadd.f32 %v1035_v17, %v971_v23  ;;  %v717_v39 = vld [vmem:[%s2890_s20 + $0x1b0] sm:$0xff]  ;;  %v1292_v43 = vadd.f32 %v1228_v33, %v1164_v28 }
 0x168   : > { %v1546_v22 = vadd.f32 %v1482_v5, %v1418_v10  ;;  %v1739_v35 = vsub.f32 %v1610_v9, %v1675_v21  ;;  %v781_v40 = vld [vmem:[%s2898_s13 + $0x1b0] sm:$0xff]  ;;  %v1484_v44 = vld [vmem:[%s2929_s25 + $0x1a8] sm:$0xff]  ;;  %v1100_v50 = vadd.f32 %v1036_v31, %v972_v38  ;;  %v718_v54 = vld [vmem:[%s2890_s20 + $0x1b8] sm:$0xff] }
 0x169   : > { %v909_v41 = vld [vmem:[%s2905_s27 + $0x1b0] sm:$0xff]  ;;  %v1547_v42 = vadd.f32 %v1483_v24, %v1419_v30  ;;  %v845_v45 = vadd.f32 %v781_v40, %v717_v39  ;;  %v1612_v49 = vmul.f32 %v2952_v25, %v1099_v37  ;;  %v1420_v56 = vadd.f32 %v1356_v34, %v1292_v43  ;;  %v782_v59 = vld [vmem:[%s2898_s13 + $0x1b8] sm:$0xff]  ;;  %v719_v8 = vld [vmem:[%s2890_s20 + $0x1c0] sm:$0xff] }
 0x16a   : > { %v1676_v36 = vmul.f32 %v2958_v32, %v1546_v22  ;;  %v1165_v46 = vld [vmem:[%s2915_s1 + $0x1b0] sm:$0xff]  ;;  %1803 = vst [vmem:[%s2979_s2 + $0x190] sm:$0xff] %v1739_v35  ;;  %v910_v60 = vld [vmem:[%s2905_s27 + $0x1b8] sm:$0xff]  ;;  %v1613_v61 = vmul.f32 %v2952_v25, %v1100_v50  ;;  %v846_v63 = vadd.f32 %v782_v59, %v718_v54  ;;  %v783_v9 = vld [vmem:[%s2898_s13 + $0x1c0] sm:$0xff] }
 0x16b   : > { %v1229_v47 = vld [vmem:[%s2918_s23 + $0x1b0] sm:$0xff]  ;;  %v1677_v55 = vmul.f32 %v2958_v32, %v1547_v42  ;;  %v973_v57 = vadd.f32 %v909_v41, %v845_v45  ;;  %v1166_v0 = vld [vmem:[%s2915_s1 + $0x1b8] sm:$0xff]  ;;  %v1548_v4 = vadd.f32 %v1484_v44, %v1420_v56  ;;  %v847_v13 = vadd.f32 %v783_v9, %v719_v8  ;;  %v911_v14 = vld [vmem:[%s2905_s27 + $0x1c0] sm:$0xff] }
 0x16c   : > { %v1740_v48 = vsub.f32 %v1611_v29, %v1676_v36  ;;  %v1037_v51 = vld [vmem:[%s2908_s3 + $0x1b0] sm:$0xff]  ;;  %v1293_v52 = vadd.f32 %v1229_v47, %v1165_v46  ;;  %v1230_v1 = vld [vmem:[%s2918_s23 + $0x1b8] sm:$0xff]  ;;  %v974_v11 = vadd.f32 %v910_v60, %v846_v63  ;;  %v1167_v15 = vld [vmem:[%s2915_s1 + $0x1c0] sm:$0xff] }
 0x16d   : > { %v1357_v53 = vld [vmem:[%s2925_s24 + $0x1b0] sm:$0xff]  ;;  %v1358_v2 = vld [vmem:[%s2925_s24 + $0x1b8] sm:$0xff]  ;;  %v1741_v3 = vsub.f32 %v1612_v49, %v1677_v55  ;;  %v1101_v5 = vadd.f32 %v1037_v51, %v973_v57  ;;  %v1294_v7 = vadd.f32 %v1230_v1, %v1166_v0  ;;  %v1678_v16 = vmul.f32 %v2958_v32, %v1548_v4  ;;  %v1039_v19 = vld [vmem:[%s2908_s3 + $0x1c0] sm:$0xff] }
 0x16e   : > { %v1485_v58 = vld [vmem:[%s2929_s25 + $0x1b0] sm:$0xff]  ;;  %1804 = vst [vmem:[%s2979_s2 + $0x198] sm:$0xff] %v1740_v48  ;;  %v1421_v62 = vadd.f32 %v1357_v53, %v1293_v52  ;;  %v1038_v6 = vld [vmem:[%s2908_s3 + $0x1b8] sm:$0xff]  ;;  %v1231_v20 = vld [vmem:[%s2918_s23 + $0x1c0] sm:$0xff]  ;;  %v975_v24 = vadd.f32 %v911_v14, %v847_v13 }
 0x16f   : > { %v1486_v12 = vld [vmem:[%s2929_s25 + $0x1b8] sm:$0xff]  ;;  %1805 = vst [vmem:[%s2979_s2 + $0x1a0] sm:$0xff] %v1741_v3  ;;  %v1614_v17 = vmul.f32 %v2952_v25, %v1101_v5  ;;  %v1422_v18 = vadd.f32 %v1358_v2, %v1294_v7  ;;  %v1359_v21 = vld [vmem:[%s2925_s24 + $0x1c0] sm:$0xff]  ;;  %v1102_v23 = vadd.f32 %v1038_v6, %v974_v11  ;;  %v1295_v26 = vadd.f32 %v1231_v20, %v1167_v15  ;;  %v720_v27 = vld [vmem:[%s2890_s20 + $0x1c8] sm:$0xff] }
 0x170   : > { %v1549_v10 = vadd.f32 %v1485_v58, %v1421_v62  ;;  %v784_v28 = vld [vmem:[%s2898_s13 + $0x1c8] sm:$0xff]  ;;  %v1742_v30 = vsub.f32 %v1613_v61, %v1678_v16  ;;  %v1487_v33 = vld [vmem:[%s2929_s25 + $0x1c0] sm:$0xff]  ;;  %v1103_v39 = vadd.f32 %v1039_v19, %v975_v24  ;;  %v721_v43 = vld [vmem:[%s2890_s20 + $0x1d0] sm:$0xff] }
 0x171   : > { %v912_v29 = vld [vmem:[%s2905_s27 + $0x1c8] sm:$0xff]  ;;  %v1550_v31 = vadd.f32 %v1486_v12, %v1422_v18  ;;  %v848_v34 = vadd.f32 %v784_v28, %v720_v27  ;;  %v1615_v38 = vmul.f32 %v2952_v25, %v1102_v23  ;;  %v1423_v40 = vadd.f32 %v1359_v21, %v1295_v26  ;;  %v785_v48 = vld [vmem:[%s2898_s13 + $0x1d0] sm:$0xff]  ;;  %v722_v61 = vld [vmem:[%s2890_s20 + $0x1d8] sm:$0xff] }
 0x172   : > { %v1679_v22 = vmul.f32 %v2958_v32, %v1549_v10  ;;  %v1168_v35 = vld [vmem:[%s2915_s1 + $0x1c8] sm:$0xff]  ;;  %1806 = vst [vmem:[%s2979_s2 + $0x1a8] sm:$0xff] %v1742_v30  ;;  %v913_v49 = vld [vmem:[%s2905_s27 + $0x1d0] sm:$0xff]  ;;  %v1616_v51 = vmul.f32 %v2952_v25, %v1103_v39  ;;  %v849_v52 = vadd.f32 %v785_v48, %v721_v43  ;;  %v786_v62 = vld [vmem:[%s2898_s13 + $0x1d8] sm:$0xff] }
 0x173   : > { %v1232_v36 = vld [vmem:[%s2918_s23 + $0x1c8] sm:$0xff]  ;;  %v1680_v44 = vmul.f32 %v2958_v32, %v1550_v31  ;;  %v976_v45 = vadd.f32 %v912_v29, %v848_v34  ;;  %v1551_v50 = vadd.f32 %v1487_v33, %v1423_v40  ;;  %v1169_v53 = vld [vmem:[%s2915_s1 + $0x1d0] sm:$0xff]  ;;  %v850_v2 = vadd.f32 %v786_v62, %v722_v61  ;;  %v914_v3 = vld [vmem:[%s2905_s27 + $0x1d8] sm:$0xff] }
 0x174   : > { %v1743_v37 = vsub.f32 %v1614_v17, %v1679_v22  ;;  %v1040_v41 = vld [vmem:[%s2908_s3 + $0x1c8] sm:$0xff]  ;;  %v1296_v46 = vadd.f32 %v1232_v36, %v1168_v35  ;;  %v1233_v54 = vld [vmem:[%s2918_s23 + $0x1d0] sm:$0xff]  ;;  %v977_v0 = vadd.f32 %v913_v49, %v849_v52  ;;  %v1170_v4 = vld [vmem:[%s2915_s1 + $0x1d8] sm:$0xff] }
 0x175   : > { %v1360_v42 = vld [vmem:[%s2925_s24 + $0x1c8] sm:$0xff]  ;;  %v1361_v55 = vld [vmem:[%s2925_s24 + $0x1d0] sm:$0xff]  ;;  %v1744_v56 = vsub.f32 %v1615_v38, %v1680_v44  ;;  %v1104_v57 = vadd.f32 %v1040_v41, %v976_v45  ;;  %v1297_v60 = vadd.f32 %v1233_v54, %v1169_v53  ;;  %v1681_v63 = vmul.f32 %v2958_v32, %v1551_v50  ;;  %v1042_v8 = vld [vmem:[%s2908_s3 + $0x1d8] sm:$0xff] }
 0x176   : > { %v1488_v47 = vld [vmem:[%s2929_s25 + $0x1c8] sm:$0xff]  ;;  %1807 = vst [vmem:[%s2979_s2 + $0x1b0] sm:$0xff] %v1743_v37  ;;  %v1424_v58 = vadd.f32 %v1360_v42, %v1296_v46  ;;  %v1041_v59 = vld [vmem:[%s2908_s3 + $0x1d0] sm:$0xff]  ;;  %v1234_v9 = vld [vmem:[%s2918_s23 + $0x1d8] sm:$0xff]  ;;  %v978_v13 = vadd.f32 %v914_v3, %v850_v2 }
 0x177   : > { %v1489_v1 = vld [vmem:[%s2929_s25 + $0x1d0] sm:$0xff]  ;;  %1808 = vst [vmem:[%s2979_s2 + $0x1b8] sm:$0xff] %v1744_v56  ;;  %v1617_v6 = vmul.f32 %v2952_v25, %v1104_v57  ;;  %v1425_v7 = vadd.f32 %v1361_v55, %v1297_v60  ;;  %v1362_v10 = vld [vmem:[%s2925_s24 + $0x1d8] sm:$0xff]  ;;  %v1745_v11 = vsub.f32 %v1616_v51, %v1681_v63  ;;  %v1105_v12 = vadd.f32 %v1041_v59, %v977_v0  ;;  %v723_v15 = vld [vmem:[%s2890_s20 + $0x1e0] sm:$0xff] }
 0x178   : > { %v1552_v5 = vadd.f32 %v1488_v47, %v1424_v58  ;;  %v1298_v14 = vadd.f32 %v1234_v9, %v1170_v4  ;;  %v787_v16 = vld [vmem:[%s2898_s13 + $0x1e0] sm:$0xff]  ;;  %v1490_v20 = vld [vmem:[%s2929_s25 + $0x1d8] sm:$0xff]  ;;  %v1106_v26 = vadd.f32 %v1042_v8, %v978_v13  ;;  %v724_v31 = vld [vmem:[%s2890_s20 + $0x1e8] sm:$0xff] }
 0x179   : > { %v915_v17 = vld [vmem:[%s2905_s27 + $0x1e0] sm:$0xff]  ;;  %v1553_v19 = vadd.f32 %v1489_v1, %v1425_v7  ;;  %v851_v21 = vadd.f32 %v787_v16, %v723_v15  ;;  %1809 = vst [vmem:[%s2979_s2 + $0x1c0] sm:$0xff] %v1745_v11  ;;  %v1618_v24 = vmul.f32 %v2952_v25, %v1105_v12  ;;  %v788_v37 = vld [vmem:[%s2898_s13 + $0x1e8] sm:$0xff]  ;;  %v725_v50 = vld [vmem:[%s2890_s20 + $0x1f0] sm:$0xff] }
 0x17a   : > { %v1682_v18 = vmul.f32 %v2958_v32, %v1552_v5  ;;  %v1171_v22 = vld [vmem:[%s2915_s1 + $0x1e0] sm:$0xff]  ;;  %v1426_v27 = vadd.f32 %v1362_v10, %v1298_v14  ;;  %v916_v38 = vld [vmem:[%s2905_s27 + $0x1e8] sm:$0xff]  ;;  %v1619_v40 = vmul.f32 %v2952_v25, %v1106_v26  ;;  %v852_v42 = vadd.f32 %v788_v37, %v724_v31  ;;  %v789_v51 = vld [vmem:[%s2898_s13 + $0x1f0] sm:$0xff] }
 0x17b   : > { %v1235_v23 = vld [vmem:[%s2918_s23 + $0x1e0] sm:$0xff]  ;;  %v1683_v34 = vmul.f32 %v2958_v32, %v1553_v19  ;;  %v979_v35 = vadd.f32 %v915_v17, %v851_v21  ;;  %v1172_v43 = vld [vmem:[%s2915_s1 + $0x1e8] sm:$0xff]  ;;  %v853_v56 = vadd.f32 %v789_v51, %v725_v50  ;;  %v917_v57 = vld [vmem:[%s2905_s27 + $0x1f0] sm:$0xff] }
 0x17c   : > { %v1043_v28 = vld [vmem:[%s2908_s3 + $0x1e0] sm:$0xff]  ;;  %v1299_v29 = vadd.f32 %v1235_v23, %v1171_v22  ;;  %v1746_v33 = vsub.f32 %v1617_v6, %v1682_v18  ;;  %v1554_v39 = vadd.f32 %v1490_v20, %v1426_v27  ;;  %v1236_v44 = vld [vmem:[%s2918_s23 + $0x1e8] sm:$0xff]  ;;  %v980_v54 = vadd.f32 %v916_v38, %v852_v42  ;;  %v1173_v58 = vld [vmem:[%s2915_s1 + $0x1f0] sm:$0xff] }
 0x17d   : > { %v1363_v30 = vld [vmem:[%s2925_s24 + $0x1e0] sm:$0xff]  ;;  %v1364_v45 = vld [vmem:[%s2925_s24 + $0x1e8] sm:$0xff]  ;;  %v1747_v46 = vsub.f32 %v1618_v24, %v1683_v34  ;;  %v1107_v47 = vadd.f32 %v1043_v28, %v979_v35  ;;  %v1300_v49 = vadd.f32 %v1236_v44, %v1172_v43  ;;  %v1045_v61 = vld [vmem:[%s2908_s3 + $0x1f0] sm:$0xff]  ;;  %v981_v3 = vadd.f32 %v917_v57, %v853_v56 }
 0x17e   : > { %v1491_v36 = vld [vmem:[%s2929_s25 + $0x1e0] sm:$0xff]  ;;  %v1427_v41 = vadd.f32 %v1363_v30, %v1299_v29  ;;  %1810 = vst [vmem:[%s2979_s2 + $0x1c8] sm:$0xff] %v1746_v33  ;;  %v1044_v48 = vld [vmem:[%s2908_s3 + $0x1e8] sm:$0xff]  ;;  %v1684_v52 = vmul.f32 %v2958_v32, %v1554_v39  ;;  %v1237_v62 = vld [vmem:[%s2918_s23 + $0x1f0] sm:$0xff] }
 0x17f   : > { %v1492_v55 = vld [vmem:[%s2929_s25 + $0x1e8] sm:$0xff]  ;;  %1811 = vst [vmem:[%s2979_s2 + $0x1d0] sm:$0xff] %v1747_v46  ;;  %v1620_v59 = vmul.f32 %v2952_v25, %v1107_v47  ;;  %v1428_v60 = vadd.f32 %v1364_v45, %v1300_v49  ;;  %v1365_v63 = vld [vmem:[%s2925_s24 + $0x1f0] sm:$0xff]  ;;  %v1108_v2 = vadd.f32 %v1044_v48, %v980_v54  ;;  %v726_v4 = vld [vmem:[%s2890_s20 + $0x1f8] sm:$0xff]  ;;  %v1301_v8 = vadd.f32 %v1237_v62, %v1173_v58  ;;  %s1818_s20 = scalar_lea.sflag [#allocation4], %s2883_s17 }
 0x180   : > { %v1555_v53 = vadd.f32 %v1491_v36, %v1427_v41  ;;  %v1748_v0 = vsub.f32 %v1619_v40, %v1684_v52  ;;  %v790_v5 = vld [vmem:[%s2898_s13 + $0x1f8] sm:$0xff]  ;;  %v1109_v14 = vadd.f32 %v1045_v61, %v981_v3  ;;  %v1493_v15 = vld [vmem:[%s2929_s25 + $0x1f0] sm:$0xff] }
 0x181   : > { %v918_v6 = vld [vmem:[%s2905_s27 + $0x1f8] sm:$0xff]  ;;  %v1556_v7 = vadd.f32 %v1492_v55, %v1428_v60  ;;  %v854_v9 = vadd.f32 %v790_v5, %v726_v4  ;;  %v1621_v13 = vmul.f32 %v2952_v25, %v1108_v2  ;;  %v1429_v20 = vadd.f32 %v1365_v63, %v1301_v8 }
 0x182   : > { %v1685_v1 = vmul.f32 %v2958_v32, %v1555_v53  ;;  %v1174_v10 = vld [vmem:[%s2915_s1 + $0x1f8] sm:$0xff]  ;;  %1812 = vst [vmem:[%s2979_s2 + $0x1d8] sm:$0xff] %v1748_v0  ;;  %v1622_v27 = vmul.f32 %v2952_v25, %v1109_v14 }
 0x183   : > { %v1238_v11 = vld [vmem:[%s2918_s23 + $0x1f8] sm:$0xff]  ;;  %v1686_v19 = vmul.f32 %v2958_v32, %v1556_v7  ;;  %v982_v21 = vadd.f32 %v918_v6, %v854_v9  ;;  %v1557_v26 = vadd.f32 %v1493_v15, %v1429_v20 }
 0x184   : > { %v1749_v12 = vsub.f32 %v1620_v59, %v1685_v1  ;;  %v1046_v16 = vld [vmem:[%s2908_s3 + $0x1f8] sm:$0xff]  ;;  %v1302_v17 = vadd.f32 %v1238_v11, %v1174_v10 }
 0x185   : > { %v1366_v18 = vld [vmem:[%s2925_s24 + $0x1f8] sm:$0xff]  ;;  %v1750_v24 = vsub.f32 %v1621_v13, %v1686_v19  ;;  %v1110_v28 = vadd.f32 %v1046_v16, %v982_v21  ;;  %v1687_v30 = vmul.f32 %v2958_v32, %v1557_v26 }
 0x186   : > { %v1494_v22 = vld [vmem:[%s2929_s25 + $0x1f8] sm:$0xff]  ;;  %1813 = vst [vmem:[%s2979_s2 + $0x1e0] sm:$0xff] %v1749_v12  ;;  %v1430_v23 = vadd.f32 %v1366_v18, %v1302_v17 }
 0x187   : > { %1814 = vst [vmem:[%s2979_s2 + $0x1e8] sm:$0xff] %v1750_v24  ;;  %v1623_v31 = vmul.f32 %v2952_v25, %v1110_v28  ;;  %v1751_v34 = vsub.f32 %v1622_v27, %v1687_v30 }
 0x188   : > { %v1558_v29 = vadd.f32 %v1494_v22, %v1430_v23 }
 0x189   : > { %1815 = vst [vmem:[%s2979_s2 + $0x1f0] sm:$0xff] %v1751_v34 }
 0x18a   : > { %v1688_v33 = vmul.f32 %v2958_v32, %v1558_v29 }
 0x18c   : > { %v1752_v35 = vsub.f32 %v1623_v31, %v1688_v33 }
 0x18e   : > { %1816 = vst [vmem:[%s2979_s2 + $0x1f8] sm:$0xff] %v1752_v35 }
 0x18f   : > { %2502 = shalt.err (!%p2499_p9)
}
 0x190   : > { %s2566_s17 = smov 128   ;;  %s2567_s11 = smov 8  }
 0x191   : > { %2144 = dma.vmem_to_hbm [thread:$0]  (%p2758_p2), %s1831_s18, 8192, %s1833_s19, %s1818_s20, %s2566_s17, %s2566_s17, %s2567_s11  }
 0x192 PF: > { %s1847_s23 = sand.u32 1, %s2549_s30   ;;  %p3742_p3 = scmp.ge.s32.totalorder %s2561_s12, 2 }
 0x193   : > { %s1848_s24 = scalar_lea.sflag [#allocation4], %s1847_s23 }
 0x194   : > { %p2176_p10 = pnand %p3742_p3, %p2762_p4 }
 0x196   : > { %p2177_p11 = pneg %p2176_p10 }
 0x198   : > { %2544 = dma.done.wait (%p2177_p11), %s1848_s24, 8192  }
 0x199   : > { %2546 = vsyncadd (%p2177_p11), %s1848_s24, 4294959104  ;;  %s3743_s12 = sld [smem:[#allocation27_spill]]  ;;  %s3746_s30 = smov %s2553_s10 }
 0x19a   : > { %s3744_s0 = sld [smem:[#allocation26_spill]] }
 0x19b   : > { %s3745_s11 = sld [smem:[#allocation28_spill]] }
 0x19f   : > { %p35_p8 = scmp.ge.s32.totalorder %s3743_s12, 4  }
 0x1a0   : > { %s3747_s10 = smov %s3744_s0 }
 0x1a1   :  { %37 = sbr.rel (!%p35_p8) target bundleno = 25 (0x19), region = 191 }
 0x1a6   :  { %1854 = vsyncpa [#allocation3], 1 }
 0x1a7   :  { %1856 = vsyncpa [#allocation3 + $0x1], 1 }
 0x1a8   :  { %1857 = vsyncpa [#allocation8], 1 }
 0x1a9   :  { %1859 = vsyncpa [#allocation8 + $0x1], 1 }
 0x1aa   :  { %1860 = vsyncpa [#allocation11], 1 }
 0x1ab   :  { %1862 = vsyncpa [#allocation11 + $0x1], 1 }
 0x1ac   :  { %1863 = vsyncpa [#allocation14], 1 }
 0x1ad   :  { %1865 = vsyncpa [#allocation14 + $0x1], 1 }
 0x1ae   :  { %1866 = vsyncpa [#allocation17], 1 }
 0x1af   :  { %1868 = vsyncpa [#allocation17 + $0x1], 1 }
 0x1b0   :  { %1869 = vsyncpa [#allocation4], 1 }
 0x1b1   :  { %1871 = vsyncpa [#allocation4 + $0x1], 1 }
 0x1b2   :  { %1872 = vsyncpa [#allocation5], 1 }
 0x1b3   :  { %1874 = vsyncpa [#allocation5 + $0x1], 1 }

</bundles_post_ra>
